<compile_context>
chip_gen: v6e
topology: v6e:2x2x1
jax: 0.10.0
libtpu: 0.0.40
codegen_flags: <defaults>
</compile_context>

<pallas_src>
import functools

import jax
import jax.numpy as jnp
from jax.experimental import pallas as pl
from jax.experimental.pallas import tpu as pltpu

NUM_CLASSES = 10
IN_FEATURES = 28 * 28          # 784
K_PAD = 896                    # 7 * 128 lane-aligned padded input features
H1, H2, H3 = 256, 512, 1024
OUT_PAD = 128                  # lane-dense padded class dimension
NEG_BIG = -1e30                # baked-in softmax mask for padded class columns


def _round_up(n, m):
    return (n + m - 1) // m * m


def mlp_kernel(x_ref, w1_ref, b1_ref, w2_ref, b2_ref,
               w3_ref, b3_ref, w4_ref, b4_ref, o_ref):
    # bf16 operands on the MXU, f32 accumulation, f32 elementwise math.
    h = jnp.dot(x_ref[...], w1_ref[...], preferred_element_type=jnp.float32)
    h = jax.nn.sigmoid(h + b1_ref[...])

    h = jnp.dot(h.astype(jnp.bfloat16), w2_ref[...],
                preferred_element_type=jnp.float32)
    h = jax.nn.sigmoid(h + b2_ref[...])

    h = jnp.dot(h.astype(jnp.bfloat16), w3_ref[...],
                preferred_element_type=jnp.float32)
    h = jax.nn.sigmoid(h + b3_ref[...])

    logits = jnp.dot(h.astype(jnp.bfloat16), w4_ref[...],
                     preferred_element_type=jnp.float32)
    # b4 already carries -1e30 on the padded class columns -> exp() underflows
    # to 0 there, so no explicit iota/where mask is needed.
    logits = logits + b4_ref[...]

    # softmax over the class axis
    m = jnp.max(logits, axis=-1, keepdims=True)
    e = jnp.exp(logits - m)
    denom = jnp.sum(e, axis=-1, keepdims=True)
    o_ref[...] = e * pl.reciprocal(denom, approx=True)


@functools.partial(jax.jit, static_argnames=("block_b",))
def mlp_forward(x_nchw, padded_params, block_b=256):
    """x_nchw: (B, 1, 28, 28) float32 -> (B, 10) float32 softmax probabilities."""
    B = x_nchw.shape[0]
    x = x_nchw.reshape(B, -1).astype(jnp.float32)   # (B, 784), like torch x.view(B, -1)

    # Batch tile: multiple of 8 sublanes, capped at block_b (256 rows feed the
    # 256-row MXU on v6e/v7x and is 2x128 rows on v5e).
    tb = min(block_b, _round_up(B, 8))
    b_pad = _round_up(B, tb)

    # Zero-pad batch rows and feature lanes; cast the MXU operand to bf16.
    x = jnp.pad(x, ((0, b_pad - B), (0, K_PAD - IN_FEATURES))).astype(jnp.bfloat16)

    (w1, b1), (w2, b2), (w3, b3), (w4, b4) = padded_params
    args = (x, w1, b1, w2, b2, w3, b3, w4, b4)

    grid = (b_pad // tb,)

    def resident(shape):
        # Same block every grid step -> stays VMEM-resident (no re-DMA).
        return pl.BlockSpec(shape, lambda i: (0, 0))

    in_specs = [
        pl.BlockSpec((tb, K_PAD), lambda i: (i, 0)),   # batch-tiled input
        resident((K_PAD, H1)), resident((1, H1)),
        resident((H1, H2)), resident((1, H2)),
        resident((H2, H3)), resident((1, H3)),
        resident((H3, OUT_PAD)), resident((1, OUT_PAD)),
    ]
    out_spec = pl.BlockSpec((tb, OUT_PAD), lambda i: (i, 0))

    flops = 2 * b_pad * (K_PAD * H1 + H1 * H2 + H2 * H3 + H3 * OUT_PAD)
    transcendentals = b_pad * (H1 + H2 + H3 + OUT_PAD)
    bytes_accessed = (x.size * x.dtype.itemsize
                      + sum(a.size * a.dtype.itemsize for a in args[1:])
                      + b_pad * OUT_PAD * 4)

    out = pl.pallas_call(
        mlp_kernel,
        out_shape=jax.ShapeDtypeStruct((b_pad, OUT_PAD), jnp.float32),
        grid=grid,
        in_specs=in_specs,
        out_specs=out_spec,
        compiler_params=pltpu.CompilerParams(
            dimension_semantics=("parallel",),
            vmem_limit_bytes=32 * 1024 * 1024,
        ),
        cost_estimate=pl.CostEstimate(
            flops=flops,
            transcendentals=transcendentals,
            bytes_accessed=bytes_accessed,
        ),
    )(*args)

    return out[:B, :NUM_CLASSES]


def init_params(key):
    """Deterministic init matching nn.Linear; weights stored as (in, out), f32."""
    dims = [(IN_FEATURES, H1), (H1, H2), (H2, H3), (H3, NUM_CLASSES)]
    params = []
    for fan_in, fan_out in dims:
        kw, kb, key = jax.random.split(key, 3)
        bound = 1.0 / float(fan_in) ** 0.5
        w = jax.random.uniform(kw, (fan_in, fan_out), jnp.float32, -bound, bound)
        b = jax.random.uniform(kb, (1, fan_out), jnp.float32, -bound, bound)
        params.append((w, b))
    return params


def prepare_params(params):
    """Pad to MXU-aligned shapes; weights -> bf16, biases stay f32.

    The final bias's padded class columns are filled with -1e30 so the softmax
    mask is baked into the bias add (no in-kernel masking needed)."""
    (w1, b1), (w2, b2), (w3, b3), (w4, b4) = params
    w1p = jnp.pad(w1, ((0, K_PAD - IN_FEATURES), (0, 0)))
    w4p = jnp.pad(w4, ((0, 0), (0, OUT_PAD - NUM_CLASSES)))
    b4p = jnp.pad(b4, ((0, 0), (0, OUT_PAD - NUM_CLASSES)),
                  constant_values=NEG_BIG)
    bf16 = lambda w: w.astype(jnp.bfloat16)
    return ((bf16(w1p), b1), (bf16(w2), b2), (bf16(w3), b3), (bf16(w4p), b4p))


def mlp_reference(x_nchw, params):
    x = x_nchw.reshape(x_nchw.shape[0], -1)
    (w1, b1), (w2, b2), (w3, b3), (w4, b4) = params
    h = jax.nn.sigmoid(x @ w1 + b1)
    h = jax.nn.sigmoid(h @ w2 + b2)
    h = jax.nn.sigmoid(h @ w3 + b3)
    return jax.nn.softmax(h @ w4 + b4, axis=1)


if __name__ == "__main__":
    key = jax.random.PRNGKey(0)
    kx, kp = jax.random.split(key)

    B = 2
    x = jax.random.normal(kx, (B, 1, 28, 28), jnp.float32)   # NCHW, like PyTorch
    params = init_params(kp)
    padded_params = prepare_params(params)

    out = mlp_forward(x, padded_params)
    out = jax.block_until_ready(out)

    ref = mlp_reference(x, params)
    assert out.shape == (B, NUM_CLASSES)
    # bf16 MXU operands + approx reciprocal -> looser tolerance than pure f32.
    assert jnp.allclose(out, ref, atol=3e-2, rtol=3e-2), float(jnp.max(jnp.abs(out - ref)))
    assert jnp.allclose(jnp.sum(out, axis=1), jnp.ones((B,)), atol=1e-2)

    print("KERNEL_OK")
</pallas_src>

<mosaic_0001>
module attributes {stable_mosaic.version = 11 : i64} {
  func.func @mlp_kernel(%arg0: i32, %arg1: memref<8x896xbf16, #tpu.memory_space<vmem>>, %arg2: memref<896x256xbf16, #tpu.memory_space<vmem>>, %arg3: memref<1x256xf32, #tpu.memory_space<vmem>>, %arg4: memref<256x512xbf16, #tpu.memory_space<vmem>>, %arg5: memref<1x512xf32, #tpu.memory_space<vmem>>, %arg6: memref<512x1024xbf16, #tpu.memory_space<vmem>>, %arg7: memref<1x1024xf32, #tpu.memory_space<vmem>>, %arg8: memref<1024x128xbf16, #tpu.memory_space<vmem>>, %arg9: memref<1x128xf32, #tpu.memory_space<vmem>>, %arg10: memref<8x128xf32, #tpu.memory_space<vmem>>) attributes {dimension_semantics = [#tpu.dimension_semantics<parallel>], iteration_bounds = array<i64: 1>, scalar_prefetch = 0 : i64, scratch_operands = 0 : i64, tpu.core_type = #tpu.core_type<tc>, window_params = [{transform_indices = @transform_0, window_bounds = array<i64: 8, 896>}, {pipeline_mode = #tpu.pipeline_mode<synchronous>, transform_indices = @transform_1, window_bounds = array<i64: 896, 256>}, {pipeline_mode = #tpu.pipeline_mode<synchronous>, transform_indices = @transform_2, window_bounds = array<i64: 1, 256>}, {pipeline_mode = #tpu.pipeline_mode<synchronous>, transform_indices = @transform_3, window_bounds = array<i64: 256, 512>}, {pipeline_mode = #tpu.pipeline_mode<synchronous>, transform_indices = @transform_4, window_bounds = array<i64: 1, 512>}, {pipeline_mode = #tpu.pipeline_mode<synchronous>, transform_indices = @transform_5, window_bounds = array<i64: 512, 1024>}, {pipeline_mode = #tpu.pipeline_mode<synchronous>, transform_indices = @transform_6, window_bounds = array<i64: 1, 1024>}, {pipeline_mode = #tpu.pipeline_mode<synchronous>, transform_indices = @transform_7, window_bounds = array<i64: 1024, 128>}, {pipeline_mode = #tpu.pipeline_mode<synchronous>, transform_indices = @transform_8, window_bounds = array<i64: 1, 128>}, {transform_indices = @transform_9, window_bounds = array<i64: 8, 128>}]} {
    %c0 = arith.constant 0 : index
    %c0_0 = arith.constant 0 : index
    %0 = vector.load %arg1[%c0, %c0_0] : memref<8x896xbf16, #tpu.memory_space<vmem>>, vector<8x896xbf16>
    %c0_1 = arith.constant 0 : index
    %c0_2 = arith.constant 0 : index
    %1 = vector.load %arg2[%c0_1, %c0_2] : memref<896x256xbf16, #tpu.memory_space<vmem>>, vector<896x256xbf16>
    %cst = arith.constant dense<0.000000e+00> : vector<8x256xf32>
    %2 = tpu.matmul %0, %1, %cst {dimension_numbers = #tpu.dot_dimension_numbers<[1], [0], [0], [1], [0, 0, 1, 1], [], []>} : vector<8x896xbf16>, vector<896x256xbf16>, vector<8x256xf32> -> vector<8x256xf32>
    %c0_3 = arith.constant 0 : index
    %c0_4 = arith.constant 0 : index
    %3 = vector.load %arg3[%c0_3, %c0_4] : memref<1x256xf32, #tpu.memory_space<vmem>>, vector<1x256xf32>
    %4 = vector.broadcast %3 : vector<1x256xf32> to vector<8x256xf32>
    %5 = arith.addf %2, %4 : vector<8x256xf32>
    %6 = arith.negf %5 : vector<8x256xf32>
    %7 = math.exp %6 : vector<8x256xf32>
    %cst_5 = arith.constant 1.000000e+00 : f32
    %8 = vector.broadcast %cst_5 : f32 to vector<8x256xf32>
    %9 = arith.addf %8, %7 : vector<8x256xf32>
    %10 = arith.divf %8, %9 : vector<8x256xf32>
    %11 = arith.truncf %10 : vector<8x256xf32> to vector<8x256xbf16>
    %c0_6 = arith.constant 0 : index
    %c0_7 = arith.constant 0 : index
    %12 = vector.load %arg4[%c0_6, %c0_7] : memref<256x512xbf16, #tpu.memory_space<vmem>>, vector<256x512xbf16>
    %cst_8 = arith.constant dense<0.000000e+00> : vector<8x512xf32>
    %13 = tpu.matmul %11, %12, %cst_8 {dimension_numbers = #tpu.dot_dimension_numbers<[1], [0], [0], [1], [0, 0, 1, 1], [], []>} : vector<8x256xbf16>, vector<256x512xbf16>, vector<8x512xf32> -> vector<8x512xf32>
    %c0_9 = arith.constant 0 : index
    %c0_10 = arith.constant 0 : index
    %14 = vector.load %arg5[%c0_9, %c0_10] : memref<1x512xf32, #tpu.memory_space<vmem>>, vector<1x512xf32>
    %15 = vector.broadcast %14 : vector<1x512xf32> to vector<8x512xf32>
    %16 = arith.addf %13, %15 : vector<8x512xf32>
    %17 = arith.negf %16 : vector<8x512xf32>
    %18 = math.exp %17 : vector<8x512xf32>
    %cst_11 = arith.constant 1.000000e+00 : f32
    %19 = vector.broadcast %cst_11 : f32 to vector<8x512xf32>
    %20 = arith.addf %19, %18 : vector<8x512xf32>
    %21 = arith.divf %19, %20 : vector<8x512xf32>
    %22 = arith.truncf %21 : vector<8x512xf32> to vector<8x512xbf16>
    %c0_12 = arith.constant 0 : index
    %c0_13 = arith.constant 0 : index
    %23 = vector.load %arg6[%c0_12, %c0_13] : memref<512x1024xbf16, #tpu.memory_space<vmem>>, vector<512x1024xbf16>
    %cst_14 = arith.constant dense<0.000000e+00> : vector<8x1024xf32>
    %24 = tpu.matmul %22, %23, %cst_14 {dimension_numbers = #tpu.dot_dimension_numbers<[1], [0], [0], [1], [0, 0, 1, 1], [], []>} : vector<8x512xbf16>, vector<512x1024xbf16>, vector<8x1024xf32> -> vector<8x1024xf32>
    %c0_15 = arith.constant 0 : index
    %c0_16 = arith.constant 0 : index
    %25 = vector.load %arg7[%c0_15, %c0_16] : memref<1x1024xf32, #tpu.memory_space<vmem>>, vector<1x1024xf32>
    %26 = vector.broadcast %25 : vector<1x1024xf32> to vector<8x1024xf32>
    %27 = arith.addf %24, %26 : vector<8x1024xf32>
    %28 = arith.negf %27 : vector<8x1024xf32>
    %29 = math.exp %28 : vector<8x1024xf32>
    %cst_17 = arith.constant 1.000000e+00 : f32
    %30 = vector.broadcast %cst_17 : f32 to vector<8x1024xf32>
    %31 = arith.addf %30, %29 : vector<8x1024xf32>
    %32 = arith.divf %30, %31 : vector<8x1024xf32>
    %33 = arith.truncf %32 : vector<8x1024xf32> to vector<8x1024xbf16>
    %c0_18 = arith.constant 0 : index
    %c0_19 = arith.constant 0 : index
    %34 = vector.load %arg8[%c0_18, %c0_19] : memref<1024x128xbf16, #tpu.memory_space<vmem>>, vector<1024x128xbf16>
    %cst_20 = arith.constant dense<0.000000e+00> : vector<8x128xf32>
    %35 = tpu.matmul %33, %34, %cst_20 {dimension_numbers = #tpu.dot_dimension_numbers<[1], [0], [0], [1], [0, 0, 1, 1], [], []>} : vector<8x1024xbf16>, vector<1024x128xbf16>, vector<8x128xf32> -> vector<8x128xf32>
    %c0_21 = arith.constant 0 : index
    %c0_22 = arith.constant 0 : index
    %36 = vector.load %arg9[%c0_21, %c0_22] : memref<1x128xf32, #tpu.memory_space<vmem>>, vector<1x128xf32>
    %37 = vector.broadcast %36 : vector<1x128xf32> to vector<8x128xf32>
    %38 = arith.addf %35, %37 : vector<8x128xf32>
    %cst_23 = arith.constant dense<0xFF800000> : vector<8xf32>
    %39 = vector.multi_reduction <maximumf>, %38, %cst_23 [1] : vector<8x128xf32> to vector<8xf32>
    %40 = vector.shape_cast %39 : vector<8xf32> to vector<8x1xf32>
    %41 = vector.broadcast %40 : vector<8x1xf32> to vector<8x128xf32>
    %42 = arith.subf %38, %41 : vector<8x128xf32>
    %43 = math.exp %42 : vector<8x128xf32>
    %cst_24 = arith.constant dense<0.000000e+00> : vector<8xf32>
    %44 = vector.multi_reduction <add>, %43, %cst_24 [1] : vector<8x128xf32> to vector<8xf32>
    %45 = vector.shape_cast %44 : vector<8xf32> to vector<8x1xf32>
    %46 = tpu.reciprocal %45 {approx = true} : vector<8x1xf32> -> vector<8x1xf32>
    %47 = vector.broadcast %46 : vector<8x1xf32> to vector<8x128xf32>
    %48 = arith.mulf %43, %47 : vector<8x128xf32>
    %c0_25 = arith.constant 0 : index
    %c0_26 = arith.constant 0 : index
    %49 = vector.load %arg10[%c0_25, %c0_26] : memref<8x128xf32, #tpu.memory_space<vmem>>, vector<8x128xf32>
    tpu.vector_store %arg10[%c0_25, %c0_26], %48 {strides = array<i32>} : memref<8x128xf32, #tpu.memory_space<vmem>>, vector<8x128xf32>,
    return
  }
  func.func @transform_0(%arg0: i32) -> (i32, i32) {
    %c0_i32 = arith.constant 0 : i32
    %c0_i32_0 = arith.constant 0 : i32
    return %arg0, %c0_i32 : i32, i32
  }
  func.func @transform_1(%arg0: i32) -> (i32, i32) {
    %c0_i32 = arith.constant 0 : i32
    %c0_i32_0 = arith.constant 0 : i32
    %c0_i32_1 = arith.constant 0 : i32
    return %c0_i32, %c0_i32_0 : i32, i32
  }
  func.func @transform_2(%arg0: i32) -> (i32, i32) {
    %c0_i32 = arith.constant 0 : i32
    %c0_i32_0 = arith.constant 0 : i32
    %c0_i32_1 = arith.constant 0 : i32
    return %c0_i32, %c0_i32_0 : i32, i32
  }
  func.func @transform_3(%arg0: i32) -> (i32, i32) {
    %c0_i32 = arith.constant 0 : i32
    %c0_i32_0 = arith.constant 0 : i32
    %c0_i32_1 = arith.constant 0 : i32
    return %c0_i32, %c0_i32_0 : i32, i32
  }
  func.func @transform_4(%arg0: i32) -> (i32, i32) {
    %c0_i32 = arith.constant 0 : i32
    %c0_i32_0 = arith.constant 0 : i32
    %c0_i32_1 = arith.constant 0 : i32
    return %c0_i32, %c0_i32_0 : i32, i32
  }
  func.func @transform_5(%arg0: i32) -> (i32, i32) {
    %c0_i32 = arith.constant 0 : i32
    %c0_i32_0 = arith.constant 0 : i32
    %c0_i32_1 = arith.constant 0 : i32
    return %c0_i32, %c0_i32_0 : i32, i32
  }
  func.func @transform_6(%arg0: i32) -> (i32, i32) {
    %c0_i32 = arith.constant 0 : i32
    %c0_i32_0 = arith.constant 0 : i32
    %c0_i32_1 = arith.constant 0 : i32
    return %c0_i32, %c0_i32_0 : i32, i32
  }
  func.func @transform_7(%arg0: i32) -> (i32, i32) {
    %c0_i32 = arith.constant 0 : i32
    %c0_i32_0 = arith.constant 0 : i32
    %c0_i32_1 = arith.constant 0 : i32
    return %c0_i32, %c0_i32_0 : i32, i32
  }
  func.func @transform_8(%arg0: i32) -> (i32, i32) {
    %c0_i32 = arith.constant 0 : i32
    %c0_i32_0 = arith.constant 0 : i32
    %c0_i32_1 = arith.constant 0 : i32
    return %c0_i32, %c0_i32_0 : i32, i32
  }
  func.func @transform_9(%arg0: i32) -> (i32, i32) {
    %c0_i32 = arith.constant 0 : i32
    %c0_i32_0 = arith.constant 0 : i32
    return %arg0, %c0_i32 : i32, i32
  }
}

</mosaic_0001>

<bundles_post_ra>
// kernel: mlp_forward.1
= control target key start
LH: loop header
LB: loop body
LE: loop exit
PB: predicated region body
PF: predicated region fallthrough
CT: control target
= control target key end

     0   :  { %14 = vsyncpa [#allocation3], 0  ;;  %s5467_s0 = inlined_call_operand.vmem [shape: bf16[8,896], index: 0, kind: input, shape index: {}]   ;;  %s5468_s1 = inlined_call_operand.hbm [shape: bf16[896,256], index: 1, kind: input, shape index: {}]   ;;  %s5469_s2 = inlined_call_operand.vmem [shape: f32[1,256], index: 2, kind: input, shape index: {}]   ;;  %s5470_s3 = inlined_call_operand.hbm [shape: bf16[256,512], index: 3, kind: input, shape index: {}]   ;;  %s5471_s4 = inlined_call_operand.vmem [shape: f32[1,512], index: 4, kind: input, shape index: {}]   ;;  %s5472_s5 = inlined_call_operand.hbm [shape: bf16[512,1024], index: 5, kind: input, shape index: {}]   ;;  %s5473_s6 = inlined_call_operand.vmem [shape: f32[1,1024], index: 6, kind: input, shape index: {}]   ;;  %s5474_s7 = inlined_call_operand.hbm [shape: bf16[1024,128], index: 7, kind: input, shape index: {}]   ;;  %s5475_s8 = inlined_call_operand.vmem [shape: f32[1,128], index: 8, kind: input, shape index: {}]   ;;  %s5476_s9 = inlined_call_operand.vmem [shape: f32[8,128], index: 9, kind: output, shape index: {}]  }
   0x1   :  { %15 = vsyncpa [#allocation5], 0 }
   0x2   :  { %16 = vsyncpa [#allocation8], 0  ;;  %s5253_s30 = smov [#allocation4]  }
   0x3   :  { %s38_s10 = sshll.u32 %s5253_s30, 4  ;;  %s39_s10 = int_to_ptr.vmem [resolvable:$true] %s38_s10 }
   0x4   :  { %s5175_s11 = scalar_lea.vmem %s39_s10, 8192  ;;  %p5180_p1 = scmp.lt.s32.totalorder %s39_s10, %s39_s10 }
   0x5   :  { %p5176_p0 = scmp.ne.s32.totalorder %s39_s10, %s5175_s11  ;;  %p5181_p2 = scmp.lt.s32.totalorder %s5175_s11, %s5175_s11 }
   0x7   :  { %p5182_p3 = por %p5181_p2, %p5180_p1 }
   0x9   :  { %p5183_p4 = pnand %p5182_p3, %p5176_p0 }
   0xb   :  { %5186 = shalt.err (!%p5183_p4)
}
   0xc   :  { %s5254_s12 = smov 256   ;;  %s5255_s13 = smov 16  }
   0xd   :  { %44 = dma.hbm_to_vmem [thread:$0]  %s5470_s3, 8192, %s39_s10, [#allocation5], %s5254_s12, %s5254_s12, %s5255_s13  }
   0xe   :  { %s5256_s16 = smov [#allocation2]  }
   0xf   :  { %s24_s17 = sshll.u32 %s5256_s16, 4  ;;  %s25_s17 = int_to_ptr.vmem [resolvable:$true] %s24_s17 }
  0x10   :  { %s5195_s18 = scalar_lea.vmem %s25_s17, 14336  ;;  %p5200_p6 = scmp.lt.s32.totalorder %s25_s17, %s25_s17 }
  0x11   :  { %p5196_p5 = scmp.ne.s32.totalorder %s25_s17, %s5195_s18  ;;  %p5201_p7 = scmp.lt.s32.totalorder %s5195_s18, %s5195_s18 }
  0x13   :  { %p5202_p8 = por %p5201_p7, %p5200_p6 }
  0x15   :  { %p5203_p9 = pnand %p5202_p8, %p5196_p5 }
  0x17   :  { %5206 = shalt.err (!%p5203_p9)
}
  0x18   :  { %s5257_s19 = smov 128   ;;  %s5258_s20 = smov 8  }
  0x19   :  { %30 = dma.hbm_to_vmem [thread:$0]  %s5468_s1, 14336, %s25_s17, [#allocation3], %s5257_s19, %s5257_s19, %s5258_s20  }
  0x1a   :  { %s5259_s23 = smov [#allocation6]  }
  0x1b   :  { %s52_s24 = sshll.u32 %s5259_s23, 4  ;;  %s53_s24 = int_to_ptr.vmem [resolvable:$true] %s52_s24 }
  0x1c   :  { %s5215_s3 = scalar_lea.vmem %s53_s24, 32768  ;;  %p5220_p11 = scmp.lt.s32.totalorder %s53_s24, %s53_s24 }
  0x1d   :  { %p5216_p10 = scmp.ne.s32.totalorder %s53_s24, %s5215_s3  ;;  %p5221_p12 = scmp.lt.s32.totalorder %s5215_s3, %s5215_s3 }
  0x1f   :  { %p5222_p13 = por %p5221_p12, %p5220_p11 }
  0x21   :  { %p5223_p0 = pnand %p5222_p13, %p5216_p10 }
  0x23   :  { %5226 = shalt.err (!%p5223_p0)
}
  0x24   :  { %s5260_s25 = smov 512   ;;  %s5261_s26 = smov 32  }
  0x25   :  { %58 = dma.hbm_to_vmem [thread:$0]  %s5472_s5, 32768, %s53_s24, [#allocation5], %s5260_s25, %s5260_s25, %s5261_s26  }
  0x26   :  { %s5262_s29 = smov [#allocation7]  }
  0x27   :  { %s66_s30 = sshll.u32 %s5262_s29, 4  ;;  %s67_s30 = int_to_ptr.vmem [resolvable:$true] %s66_s30 }
  0x28   :  { %s5235_s1 = scalar_lea.vmem %s67_s30, 8192  ;;  %p5240_p2 = scmp.lt.s32.totalorder %s67_s30, %s67_s30 }
  0x29   :  { %p5236_p1 = scmp.ne.s32.totalorder %s67_s30, %s5235_s1  ;;  %p5241_p3 = scmp.lt.s32.totalorder %s5235_s1, %s5235_s1 }
  0x2b   :  { %p5242_p4 = por %p5241_p3, %p5240_p2 }
  0x2d   :  { %p5243_p5 = pnand %p5242_p4, %p5236_p1 }
  0x2f   :  { %5246 = shalt.err (!%p5243_p5)
}
  0x30   :  { %s5263_s10 = smov 64   ;;  %s5264_s11 = smov 4  }
  0x31   :  { %72 = dma.hbm_to_vmem [thread:$0]  %s5474_s7, 8192, %s67_s30, [#allocation8], %s5263_s10, %s5263_s10, %s5264_s11  }
  0x32   :  { %5247 = dma.done.wait [#allocation3], 14336  }
  0x33   :  { %5248 = vsyncadd [#allocation3], 4294952960 }
  0x34   :  { %5249 = dma.done.wait [#allocation5], 40960  }
  0x35   :  { %5250 = vsyncadd [#allocation5], 4294926336 }
  0x36   :  { %5251 = dma.done.wait [#allocation8], 8192  }
  0x37   :  { %5252 = vsyncadd [#allocation8], 4294959104  ;;  %v4772_v0 = vld [vmem:[#allocation2 + $0x74] ss:$8 sps:$4 sm:$0xff]   ;;  %v4774_v1 = vld [vmem:[#allocation2 + $0x70] ss:$8 sps:$4 sm:$0xff]  }
  0x38   :  { %801 = vmatprep.subr.bf16.mxu0 %v4772_v0  ;;  %v4775_v2 = vld [vmem:[#allocation2 + $0x174] ss:$8 sps:$4 sm:$0xff]   ;;  %v4777_v3 = vld [vmem:[#allocation2 + $0x170] ss:$8 sps:$4 sm:$0xff]   ;;  %v4778_v4 = vld [vmem:[#allocation2 + $0x64] ss:$8 sps:$4 sm:$0xff]  }
  0x39   :  { %802 = vmatpush1.bf16.msra.mxu0 %v4774_v1  ;;  %v4780_v5 = vld [vmem:[#allocation2 + $0x60] ss:$8 sps:$4 sm:$0xff]   ;;  %842 = vmatprep.subr.bf16.mxu1 %v4775_v2  ;;  %v4781_v6 = vld [vmem:[#allocation2 + $0x164] ss:$8 sps:$4 sm:$0xff]   ;;  %v4784_v8 = vld [vmem:[#allocation2 + $0x54] ss:$8 sps:$4 sm:$0xff]  }
  0x3a   :  { %843 = vmatpush1.bf16.msra.mxu1 %v4777_v3  ;;  %803 = vmatprep.subr.bf16.mxu0 %v4778_v4  ;;  %v4783_v7 = vld [vmem:[#allocation2 + $0x160] ss:$8 sps:$4 sm:$0xff]   ;;  %v4786_v9 = vld [vmem:[#allocation2 + $0x50] ss:$8 sps:$4 sm:$0xff]   ;;  %v4787_v10 = vld [vmem:[#allocation2 + $0x154] ss:$8 sps:$4 sm:$0xff]  }
  0x3b   :  { %844 = vmatprep.subr.bf16.mxu1 %v4781_v6  ;;  %v4790_v11 = vld [vmem:[#allocation2 + $0x44] ss:$8 sps:$4 sm:$0xff]   ;;  %v4789_v12 = vld [vmem:[#allocation2 + $0x150] ss:$8 sps:$4 sm:$0xff]   ;;  %v4792_v14 = vld [vmem:[#allocation2 + $0x40] ss:$8 sps:$4 sm:$0xff]  }
  0x3c   :  { %v4793_v13 = vld [vmem:[#allocation2 + $0x144] ss:$8 sps:$4 sm:$0xff]   ;;  %v4796_v15 = vld [vmem:[#allocation2 + $0x34] ss:$8 sps:$4 sm:$0xff]   ;;  %v4795_v16 = vld [vmem:[#allocation2 + $0x140] ss:$8 sps:$4 sm:$0xff]  }
  0x3d   :  { %804 = vmatpush1.bf16.msra.mxu0 %v4780_v5  ;;  %v4799_v17 = vld [vmem:[#allocation2 + $0x134] ss:$8 sps:$4 sm:$0xff]   ;;  %v4798_v18 = vld [vmem:[#allocation2 + $0x30] ss:$8 sps:$4 sm:$0xff]   ;;  %v4802_v19 = vld [vmem:[#allocation2 + $0x24] ss:$8 sps:$4 sm:$0xff]  }
  0x3e   :  { %805 = vmatprep.subr.bf16.mxu0 %v4784_v8  ;;  %845 = vmatpush1.bf16.msra.mxu1 %v4783_v7  ;;  %v4801_v20 = vld [vmem:[#allocation2 + $0x130] ss:$8 sps:$4 sm:$0xff]   ;;  %v4805_v21 = vld [vmem:[#allocation2 + $0x124] ss:$8 sps:$4 sm:$0xff]   ;;  %v4804_v22 = vld [vmem:[#allocation2 + $0x20] ss:$8 sps:$4 sm:$0xff]  }
  0x3f   :  { %846 = vmatprep.subr.bf16.mxu1 %v4787_v10  ;;  %v4808_v23 = vld [vmem:[#allocation2 + $0x14] ss:$8 sps:$4 sm:$0xff]   ;;  %v4807_v24 = vld [vmem:[#allocation2 + $0x120] ss:$8 sps:$4 sm:$0xff]   ;;  %v4810_v26 = vld [vmem:[#allocation2 + $0x10] ss:$8 sps:$4 sm:$0xff]  }
  0x40   :  { %v4811_v25 = vld [vmem:[#allocation2 + $0x114] ss:$8 sps:$4 sm:$0xff]   ;;  %v4814_v27 = vld [vmem:[#allocation2 + $0x4] ss:$8 sps:$4 sm:$0xff]   ;;  %v4813_v28 = vld [vmem:[#allocation2 + $0x110] ss:$8 sps:$4 sm:$0xff]  }
  0x41   :  { %806 = vmatpush1.bf16.msra.mxu0 %v4786_v9  ;;  %v4817_v29 = vld [vmem:[#allocation2 + $0x104] ss:$8 sps:$4 sm:$0xff]   ;;  %v4816_v30 = vld [vmem:[#allocation2] ss:$8 sps:$4 sm:$0xff]   ;;  %v4820_v31 = vld [vmem:[#allocation2 + $0xf4] ss:$8 sps:$4 sm:$0xff]  }
  0x42   :  { %807 = vmatprep.subr.bf16.mxu0 %v4790_v11  ;;  %847 = vmatpush1.bf16.msra.mxu1 %v4789_v12  ;;  %v4819_v32 = vld [vmem:[#allocation2 + $0x100] ss:$8 sps:$4 sm:$0xff]   ;;  %v4823_v33 = vld [vmem:[#allocation2 + $0x1f4] ss:$8 sps:$4 sm:$0xff]   ;;  %v4822_v34 = vld [vmem:[#allocation2 + $0xf0] ss:$8 sps:$4 sm:$0xff]  }
  0x43   :  { %848 = vmatprep.subr.bf16.mxu1 %v4793_v13  ;;  %v4826_v35 = vld [vmem:[#allocation2 + $0xe4] ss:$8 sps:$4 sm:$0xff]   ;;  %v4825_v36 = vld [vmem:[#allocation2 + $0x1f0] ss:$8 sps:$4 sm:$0xff]   ;;  %v4828_v38 = vld [vmem:[#allocation2 + $0xe0] ss:$8 sps:$4 sm:$0xff]  }
  0x44   :  { %v4829_v37 = vld [vmem:[#allocation2 + $0x1e4] ss:$8 sps:$4 sm:$0xff]   ;;  %v4832_v39 = vld [vmem:[#allocation2 + $0xd4] ss:$8 sps:$4 sm:$0xff]   ;;  %v4831_v40 = vld [vmem:[#allocation2 + $0x1e0] ss:$8 sps:$4 sm:$0xff]  }
  0x45   :  { %808 = vmatpush1.bf16.msra.mxu0 %v4792_v14  ;;  %v4835_v41 = vld [vmem:[#allocation2 + $0x1d4] ss:$8 sps:$4 sm:$0xff]   ;;  %v4834_v42 = vld [vmem:[#allocation2 + $0xd0] ss:$8 sps:$4 sm:$0xff]   ;;  %v4838_v43 = vld [vmem:[#allocation2 + $0xc4] ss:$8 sps:$4 sm:$0xff]  }
  0x46   :  { %809 = vmatprep.subr.bf16.mxu0 %v4796_v15  ;;  %849 = vmatpush1.bf16.msra.mxu1 %v4795_v16  ;;  %v4837_v44 = vld [vmem:[#allocation2 + $0x1d0] ss:$8 sps:$4 sm:$0xff]   ;;  %v4841_v45 = vld [vmem:[#allocation2 + $0x1c4] ss:$8 sps:$4 sm:$0xff]   ;;  %v4840_v47 = vld [vmem:[#allocation2 + $0xc0] ss:$8 sps:$4 sm:$0xff]  }
  0x47   :  { %850 = vmatprep.subr.bf16.mxu1 %v4799_v17  ;;  %v88_v46 = vld [vmem:[%s5467_s0] sm:$0xff]  ;;  %v4844_v49 = vld [vmem:[#allocation2 + $0xb4] ss:$8 sps:$4 sm:$0xff]   ;;  %v89_v50 = vld [vmem:[%s5467_s0 + $0x8] sm:$0xff]  ;;  %v5265_v15 = vmov 0  }
  0x48   :  { %v4154_v48 = vcombine.high %v88_v46, %v88_v46  ;;  %v4843_v51 = vld [vmem:[#allocation2 + $0x1c0] ss:$8 sps:$4 sm:$0xff]   ;;  %v4156_v52 = vcombine.high %v89_v50, %v89_v50  ;;  %v4847_v53 = vld [vmem:[#allocation2 + $0x1b4] ss:$8 sps:$4 sm:$0xff]   ;;  %v4846_v54 = vld [vmem:[#allocation2 + $0xb0] ss:$8 sps:$4 sm:$0xff]   ;;  %v4153_v5 = vcombine.low %v88_v46, %v88_v46  ;;  %v4155_v8 = vcombine.low %v89_v50, %v89_v50 }
  0x49   :  { %810 = vmatpush1.bf16.msra.mxu0 %v4798_v18  ;;  %v4850_v55 = vld [vmem:[#allocation2 + $0xa4] ss:$8 sps:$4 sm:$0xff]   ;;  %v4849_v56 = vld [vmem:[#allocation2 + $0x1b0] ss:$8 sps:$4 sm:$0xff]   ;;  %v4852_v58 = vld [vmem:[#allocation2 + $0xa0] ss:$8 sps:$4 sm:$0xff]  }
  0x4a   :  { %811 = vmatprep.subr.bf16.mxu0 %v4802_v19  ;;  %851 = vmatpush1.bf16.msra.mxu1 %v4801_v20  ;;  %v4853_v57 = vld [vmem:[#allocation2 + $0x1a4] ss:$8 sps:$4 sm:$0xff]   ;;  %v4856_v59 = vld [vmem:[#allocation2 + $0x94] ss:$8 sps:$4 sm:$0xff]   ;;  %v4855_v60 = vld [vmem:[#allocation2 + $0x1a0] ss:$8 sps:$4 sm:$0xff]  }
  0x4b   :  { %852 = vmatprep.subr.bf16.mxu1 %v4805_v21  ;;  %833 = vmatprep.mubr.bf16.mxu0 %v4154_v48  ;;  %v4859_v61 = vld [vmem:[#allocation2 + $0x194] ss:$8 sps:$4 sm:$0xff]   ;;  %v4858_v62 = vld [vmem:[#allocation2 + $0x90] ss:$8 sps:$4 sm:$0xff]   ;;  %v4862_v63 = vld [vmem:[#allocation2 + $0x84] ss:$8 sps:$4 sm:$0xff]  }
  0x4c   :  { %874 = vmatprep.mubr.bf16.mxu1 %v4156_v52  ;;  %v4861_v0 = vld [vmem:[#allocation2 + $0x190] ss:$8 sps:$4 sm:$0xff]   ;;  %v4865_v1 = vld [vmem:[#allocation2 + $0x184] ss:$8 sps:$4 sm:$0xff]   ;;  %v4864_v2 = vld [vmem:[#allocation2 + $0x80] ss:$8 sps:$4 sm:$0xff]  }
  0x4d   :  { %812 = vmatpush1.bf16.msra.mxu0 %v4804_v22  ;;  %v4872_v3 = vld [vmem:[#allocation2 + $0x274] ss:$8 sps:$4 sm:$0xff]   ;;  %v4869_v4 = vld [vmem:[#allocation2 + $0x180] ss:$8 sps:$4 sm:$0xff]   ;;  %v4870_v7 = vld [vmem:[#allocation2 + $0x270] ss:$8 sps:$4 sm:$0xff]  }
  0x4e   :  { %813 = vmatprep.subr.bf16.mxu0 %v4808_v23  ;;  %853 = vmatpush1.bf16.msra.mxu1 %v4807_v24  ;;  %v4898_v6 = vld [vmem:[#allocation2 + $0x374] ss:$8 sps:$4 sm:$0xff]   ;;  %v4877_v9 = vld [vmem:[#allocation2 + $0x264] ss:$8 sps:$4 sm:$0xff]   ;;  %v4896_v10 = vld [vmem:[#allocation2 + $0x370] ss:$8 sps:$4 sm:$0xff]  }
  0x4f   :  { %854 = vmatprep.subr.bf16.mxu1 %v4811_v25  ;;  %v4904_v11 = vld [vmem:[#allocation2 + $0x364] ss:$8 sps:$4 sm:$0xff]   ;;  %v4875_v12 = vld [vmem:[#allocation2 + $0x260] ss:$8 sps:$4 sm:$0xff]   ;;  %v4880_v13 = vld [vmem:[#allocation2 + $0x254] ss:$8 sps:$4 sm:$0xff]  }
  0x50   :  { %v4902_v14 = vld [vmem:[#allocation2 + $0x360] ss:$8 sps:$4 sm:$0xff]   ;;  %v4910_v16 = vld [vmem:[#allocation2 + $0x354] ss:$8 sps:$4 sm:$0xff]   ;;  %v4878_v17 = vld [vmem:[#allocation2 + $0x250] ss:$8 sps:$4 sm:$0xff]  }
  0x51   :  { %814 = vmatpush1.bf16.msra.mxu0 %v4810_v26  ;;  %v4883_v18 = vld [vmem:[#allocation2 + $0x244] ss:$8 sps:$4 sm:$0xff]   ;;  %v4881_v19 = vld [vmem:[#allocation2 + $0x240] ss:$8 sps:$4 sm:$0xff]   ;;  %v4908_v20 = vld [vmem:[#allocation2 + $0x350] ss:$8 sps:$4 sm:$0xff]  }
  0x52   :  { %815 = vmatprep.subr.bf16.mxu0 %v4814_v27  ;;  %855 = vmatpush1.bf16.msra.mxu1 %v4813_v28  ;;  %v4916_v21 = vld [vmem:[#allocation2 + $0x344] ss:$8 sps:$4 sm:$0xff]   ;;  %v4886_v22 = vld [vmem:[#allocation2 + $0x234] ss:$8 sps:$4 sm:$0xff]   ;;  %v4914_v23 = vld [vmem:[#allocation2 + $0x340] ss:$8 sps:$4 sm:$0xff]  }
  0x53   :  { %856 = vmatprep.subr.bf16.mxu1 %v4817_v29  ;;  %v4922_v24 = vld [vmem:[#allocation2 + $0x334] ss:$8 sps:$4 sm:$0xff]   ;;  %v4884_v26 = vld [vmem:[#allocation2 + $0x230] ss:$8 sps:$4 sm:$0xff]   ;;  %v4889_v28 = vld [vmem:[#allocation2 + $0x224] ss:$8 sps:$4 sm:$0xff]  }
  0x54   :  { %v5337_v25 = vld [vmem:[%s5467_s0 + $0x10] sm:$0xff]  ;;  %v4919_v48 = vld [vmem:[#allocation2 + $0x2c4] ss:$8 sps:$4 sm:$0xff]  }
  0x55   :  { %816 = vmatpush1.bf16.msra.mxu0 %v4816_v30  ;;  %v4158_v27 = vcombine.high %v5337_v25, %v5337_v25  ;;  %v4920_v29 = vld [vmem:[#allocation2 + $0x330] ss:$8 sps:$4 sm:$0xff]   ;;  %v4928_v30 = vld [vmem:[#allocation2 + $0x324] ss:$8 sps:$4 sm:$0xff]   ;;  %v4913_v46 = vld [vmem:[#allocation2 + $0x2d4] ss:$8 sps:$4 sm:$0xff]  }
  0x56   :  { %817 = vmatprep.subr.bf16.mxu0 %v4820_v31  ;;  %857 = vmatpush1.bf16.msra.mxu1 %v4819_v32  ;;  %v4887_v31 = vld [vmem:[#allocation2 + $0x220] ss:$8 sps:$4 sm:$0xff]   ;;  %v4892_v32 = vld [vmem:[#allocation2 + $0x214] ss:$8 sps:$4 sm:$0xff]   ;;  %v4931_v52 = vld [vmem:[#allocation2 + $0x2a4] ss:$8 sps:$4 sm:$0xff]  }
  0x57   :  { %858 = vmatprep.subr.bf16.mxu1 %v4823_v33  ;;  %v4926_v33 = vld [vmem:[#allocation2 + $0x320] ss:$8 sps:$4 sm:$0xff]   ;;  %v4925_v50 = vld [vmem:[#allocation2 + $0x2b4] ss:$8 sps:$4 sm:$0xff]  }
  0x59   :  { %818 = vmatpush2.bf16.msra.mxu0 %v4822_v34  ;;  %v4934_v34 = vld [vmem:[#allocation2 + $0x314] ss:$8 sps:$4 sm:$0xff]  }
  0x5a   :  { %819 = vmatprep.subr.bf16.mxu0 %v4826_v35  ;;  %859 = vmatpush2.bf16.msra.mxu1 %v4825_v36  ;;  %v4890_v35 = vld [vmem:[#allocation2 + $0x210] ss:$8 sps:$4 sm:$0xff]   ;;  %v4895_v36 = vld [vmem:[#allocation2 + $0x204] ss:$8 sps:$4 sm:$0xff]  }
  0x5b   :  { %860 = vmatprep.subr.bf16.mxu1 %v4829_v37  ;;  %v4932_v37 = vld [vmem:[#allocation2 + $0x310] ss:$8 sps:$4 sm:$0xff]  }
  0x5d   :  { %820 = vmatpush2.bf16.msra.mxu0 %v4828_v38  ;;  %v4940_v38 = vld [vmem:[#allocation2 + $0x304] ss:$8 sps:$4 sm:$0xff]  }
  0x5e   :  { %821 = vmatprep.subr.bf16.mxu0 %v4832_v39  ;;  %861 = vmatpush2.bf16.msra.mxu1 %v4831_v40  ;;  %v4893_v39 = vld [vmem:[#allocation2 + $0x200] ss:$8 sps:$4 sm:$0xff]   ;;  %v4901_v40 = vld [vmem:[#allocation2 + $0x2f4] ss:$8 sps:$4 sm:$0xff]  }
  0x5f   :  { %862 = vmatprep.subr.bf16.mxu1 %v4835_v41  ;;  %v4938_v41 = vld [vmem:[#allocation2 + $0x300] ss:$8 sps:$4 sm:$0xff]  }
  0x61   :  { %822 = vmatpush2.bf16.msra.mxu0 %v4834_v42  ;;  %v4899_v42 = vld [vmem:[#allocation2 + $0x2f0] ss:$8 sps:$4 sm:$0xff]  }
  0x62   :  { %823 = vmatprep.subr.bf16.mxu0 %v4838_v43  ;;  %863 = vmatpush2.bf16.msra.mxu1 %v4837_v44  ;;  %v4907_v43 = vld [vmem:[#allocation2 + $0x2e4] ss:$8 sps:$4 sm:$0xff]   ;;  %v4944_v44 = vld [vmem:[%s5467_s0 + $0x18] ss:$0 sps:$4 sm:$0xff]  }
  0x63   :  { %864 = vmatprep.subr.bf16.mxu1 %v4841_v45  ;;  %v4905_v45 = vld [vmem:[#allocation2 + $0x2e0] ss:$8 sps:$4 sm:$0xff]  }
  0x65   :  { %824 = vmatpush2.bf16.msra.mxu0 %v4840_v47  ;;  %v4911_v47 = vld [vmem:[#allocation2 + $0x2d0] ss:$8 sps:$4 sm:$0xff]  }
  0x66   :  { %825 = vmatprep.subr.bf16.mxu0 %v4844_v49  ;;  %865 = vmatpush2.bf16.msra.mxu1 %v4843_v51  ;;  %v4917_v49 = vld [vmem:[#allocation2 + $0x2c0] ss:$8 sps:$4 sm:$0xff]   ;;  %v4923_v51 = vld [vmem:[#allocation2 + $0x2b0] ss:$8 sps:$4 sm:$0xff]  }
  0x67   :  { %866 = vmatprep.subr.bf16.mxu1 %v4847_v53  ;;  %v4929_v53 = vld [vmem:[#allocation2 + $0x2a0] ss:$8 sps:$4 sm:$0xff]  }
  0x69   :  { %826 = vmatpush2.bf16.msra.mxu0 %v4846_v54  ;;  %v4937_v54 = vld [vmem:[#allocation2 + $0x294] ss:$8 sps:$4 sm:$0xff]  }
  0x6a   :  { %827 = vmatprep.subr.bf16.mxu0 %v4850_v55  ;;  %867 = vmatpush2.bf16.msra.mxu1 %v4849_v56  ;;  %v4935_v55 = vld [vmem:[#allocation2 + $0x290] ss:$8 sps:$4 sm:$0xff]   ;;  %v4943_v56 = vld [vmem:[#allocation2 + $0x284] ss:$8 sps:$4 sm:$0xff]  }
  0x6b   :  { %868 = vmatprep.subr.bf16.mxu1 %v4853_v57  ;;  %v4941_v57 = vld [vmem:[#allocation2 + $0x280] ss:$8 sps:$4 sm:$0xff]  }
  0x6d   :  { %828 = vmatpush2.bf16.msra.mxu0 %v4852_v58  ;;  %v4157_v58 = vcombine.low %v5337_v25, %v5337_v25  ;;  %v4989_v25 = vld [vmem:[#allocation4] ss:$16 sps:$4 sm:$0xff]  }
  0x6e   :  { %829 = vmatprep.subr.bf16.mxu0 %v4856_v59  ;;  %869 = vmatpush2.bf16.msra.mxu1 %v4855_v60  ;;  %v4947_v59 = vld [vmem:[#allocation4 + $0xe0] ss:$16 sps:$4 sm:$0xff]   ;;  %v4949_v60 = vld [vmem:[#allocation4 + $0xe4] ss:$16 sps:$4 sm:$0xff]  }
  0x6f   :  { %870 = vmatprep.subr.bf16.mxu1 %v4859_v61  ;;  %v4950_v61 = vld [vmem:[#allocation4 + $0xe8] ss:$16 sps:$4 sm:$0xff]  }
  0x71   :  { %830 = vmatpush2.bf16.msra.mxu0 %v4858_v62  ;;  %v4952_v62 = vld [vmem:[#allocation4 + $0xec] ss:$16 sps:$4 sm:$0xff]  }
  0x72   :  { %831 = vmatprep.subr.bf16.mxu0 %v4862_v63  ;;  %871 = vmatpush2.bf16.msra.mxu1 %v4861_v0  ;;  %v4955_v63 = vld [vmem:[#allocation4 + $0xc4] ss:$16 sps:$4 sm:$0xff]   ;;  %v4958_v0 = vld [vmem:[#allocation4 + $0xcc] ss:$16 sps:$4 sm:$0xff]  }
  0x73   :  { %872 = vmatprep.subr.bf16.mxu1 %v4865_v1  ;;  %v4953_v1 = vld [vmem:[#allocation4 + $0xc0] ss:$16 sps:$4 sm:$0xff]  }
  0x75   :  { %832 = vmatpush2.bf16.msra.mxu0 %v4864_v2  ;;  %v4956_v2 = vld [vmem:[#allocation4 + $0xc8] ss:$16 sps:$4 sm:$0xff]  }
  0x76   :  { %883 = vmatprep.subr.bf16.mxu0 %v4872_v3  ;;  %873 = vmatpush2.bf16.msra.mxu1 %v4869_v4  ;;  %v4961_v3 = vld [vmem:[#allocation4 + $0xa4] ss:$16 sps:$4 sm:$0xff]   ;;  %v4959_v4 = vld [vmem:[#allocation4 + $0xa0] ss:$16 sps:$4 sm:$0xff]  }
  0x77   :  { %924 = vmatprep.subr.bf16.mxu1 %v4898_v6  ;;  %v4962_v6 = vld [vmem:[#allocation4 + $0xa8] ss:$16 sps:$4 sm:$0xff]  }
  0x78   :  { %834 = vmatmul.mubr.bf16.vlgmr.msra.gmra.mxu0 %v4153_v5  ;;  %v4964_v5 = vld [vmem:[#allocation4 + $0xac] ss:$16 sps:$4 sm:$0xff]  }
  0x79   :  { %884 = vmatpush1.bf16.msra.mxu0 %v4870_v7  ;;  %875 = vmatmul.mubr.bf16.vlgmr.msra.gmra.mxu1 %v4155_v8  ;;  %v4967_v7 = vld [vmem:[#allocation4 + $0x84] ss:$16 sps:$4 sm:$0xff]   ;;  %v4970_v8 = vld [vmem:[#allocation4 + $0x8c] ss:$16 sps:$4 sm:$0xff]  }
  0x7a   :  { %885 = vmatprep.subr.bf16.mxu0 %v4877_v9  ;;  %925 = vmatpush1.bf16.msra.mxu1 %v4896_v10  ;;  %v4965_v9 = vld [vmem:[#allocation4 + $0x80] ss:$16 sps:$4 sm:$0xff]   ;;  %v4968_v10 = vld [vmem:[#allocation4 + $0x88] ss:$16 sps:$4 sm:$0xff]  }
  0x7b   :  { %956 = vmatprep.mubr.bf16.mxu1 %v5265_v15  ;;  %926 = vmatprep.subr.bf16.mxu1 %v4904_v11  ;;  %v4973_v11 = vld [vmem:[#allocation4 + $0x64] ss:$16 sps:$4 sm:$0xff]   ;;  %v4977_v15 = vld [vmem:[#allocation4 + $0x40] ss:$16 sps:$4 sm:$0xff]  }
  0x7c   :  { %915 = vmatprep.mubr.bf16.mxu0 %v4158_v27  ;;  %v4997_v27 = vld [vmem:[#allocation4 + $0x1e4] ss:$16 sps:$4 sm:$0xff]  }
  0x7d   :  { %886 = vmatpush1.bf16.msra.mxu0 %v4875_v12  ;;  %v4976_v12 = vld [vmem:[#allocation4 + $0x6c] ss:$16 sps:$4 sm:$0xff]  }
  0x7e   :  { %887 = vmatprep.subr.bf16.mxu0 %v4880_v13  ;;  %927 = vmatpush1.bf16.msra.mxu1 %v4902_v14  ;;  %v4971_v13 = vld [vmem:[#allocation4 + $0x60] ss:$16 sps:$4 sm:$0xff]   ;;  %v4974_v14 = vld [vmem:[#allocation4 + $0x68] ss:$16 sps:$4 sm:$0xff]  }
  0x7f   :  { %928 = vmatprep.subr.bf16.mxu1 %v4910_v16  ;;  %v4979_v16 = vld [vmem:[#allocation4 + $0x44] ss:$16 sps:$4 sm:$0xff]  }
  0x81   :  { %888 = vmatpush1.bf16.msra.mxu0 %v4878_v17  ;;  %v4980_v17 = vld [vmem:[#allocation4 + $0x48] ss:$16 sps:$4 sm:$0xff]  }
  0x82   :  { %889 = vmatprep.subr.bf16.mxu0 %v4883_v18  ;;  %929 = vmatpush1.bf16.msra.mxu1 %v4908_v20  ;;  %v4982_v18 = vld [vmem:[#allocation4 + $0x4c] ss:$16 sps:$4 sm:$0xff]  }
  0x83   :  { %930 = vmatprep.subr.bf16.mxu1 %v4916_v21  ;;  %v4988_v20 = vld [vmem:[#allocation4 + $0x2c] ss:$16 sps:$4 sm:$0xff]   ;;  %v4983_v21 = vld [vmem:[#allocation4 + $0x20] ss:$16 sps:$4 sm:$0xff]  }
  0x85   :  { %890 = vmatpush1.bf16.msra.mxu0 %v4881_v19  ;;  %v4985_v19 = vld [vmem:[#allocation4 + $0x24] ss:$16 sps:$4 sm:$0xff]  }
  0x86   :  { %891 = vmatprep.subr.bf16.mxu0 %v4886_v22  ;;  %931 = vmatpush1.bf16.msra.mxu1 %v4914_v23  ;;  %v4986_v22 = vld [vmem:[#allocation4 + $0x28] ss:$16 sps:$4 sm:$0xff]   ;;  %v4991_v23 = vld [vmem:[#allocation4 + $0x4] ss:$16 sps:$4 sm:$0xff]  }
  0x87   :  { %932 = vmatprep.subr.bf16.mxu1 %v4922_v24  ;;  %v4994_v24 = vld [vmem:[#allocation4 + $0xc] ss:$16 sps:$4 sm:$0xff]  }
  0x89   :  { %892 = vmatpush1.bf16.msra.mxu0 %v4884_v26  ;;  %v4992_v26 = vld [vmem:[#allocation4 + $0x8] ss:$16 sps:$4 sm:$0xff]  }
  0x8a   :  { %893 = vmatprep.subr.bf16.mxu0 %v4889_v28  ;;  %933 = vmatpush1.bf16.msra.mxu1 %v4920_v29  ;;  %v5000_v28 = vld [vmem:[#allocation4 + $0x1ec] ss:$16 sps:$4 sm:$0xff]   ;;  %v4995_v29 = vld [vmem:[#allocation4 + $0x1e0] ss:$16 sps:$4 sm:$0xff]  }
  0x8b   :  { %934 = vmatprep.subr.bf16.mxu1 %v4928_v30  ;;  %v4998_v30 = vld [vmem:[#allocation4 + $0x1e8] ss:$16 sps:$4 sm:$0xff]  }
  0x8d   :  { %894 = vmatpush1.bf16.msra.mxu0 %v4887_v31  ;;  %v5003_v31 = vld [vmem:[#allocation4 + $0x1c4] ss:$16 sps:$4 sm:$0xff]  }
  0x8e   :  { %895 = vmatprep.subr.bf16.mxu0 %v4892_v32  ;;  %935 = vmatpush1.bf16.msra.mxu1 %v4926_v33  ;;  %v5006_v32 = vld [vmem:[#allocation4 + $0x1cc] ss:$16 sps:$4 sm:$0xff]   ;;  %v5001_v33 = vld [vmem:[#allocation4 + $0x1c0] ss:$16 sps:$4 sm:$0xff]  }
  0x8f   :  { %936 = vmatprep.subr.bf16.mxu1 %v4934_v34  ;;  %v5004_v34 = vld [vmem:[#allocation4 + $0x1c8] ss:$16 sps:$4 sm:$0xff]  }
  0x91   :  { %896 = vmatpush1.bf16.msra.mxu0 %v4890_v35  ;;  %v5009_v35 = vld [vmem:[#allocation4 + $0x1a4] ss:$16 sps:$4 sm:$0xff]  }
  0x92   :  { %897 = vmatprep.subr.bf16.mxu0 %v4895_v36  ;;  %937 = vmatpush1.bf16.msra.mxu1 %v4932_v37  ;;  %v5012_v36 = vld [vmem:[#allocation4 + $0x1ac] ss:$16 sps:$4 sm:$0xff]   ;;  %v5007_v37 = vld [vmem:[#allocation4 + $0x1a0] ss:$16 sps:$4 sm:$0xff]  }
  0x93   :  { %938 = vmatprep.subr.bf16.mxu1 %v4940_v38  ;;  %v5010_v38 = vld [vmem:[#allocation4 + $0x1a8] ss:$16 sps:$4 sm:$0xff]  }
  0x95   :  { %898 = vmatpush1.bf16.msra.mxu0 %v4893_v39  ;;  %v5015_v39 = vld [vmem:[#allocation4 + $0x184] ss:$16 sps:$4 sm:$0xff]  }
  0x96   :  { %899 = vmatprep.subr.bf16.mxu0 %v4901_v40  ;;  %939 = vmatpush1.bf16.msra.mxu1 %v4938_v41  ;;  %v5018_v40 = vld [vmem:[#allocation4 + $0x18c] ss:$16 sps:$4 sm:$0xff]   ;;  %v5013_v41 = vld [vmem:[#allocation4 + $0x180] ss:$16 sps:$4 sm:$0xff]  }
  0x97   :  { %1385 = vmatprep.subr.bf16.mxu1 %v4949_v60  ;;  %v5348_v60 = vld [vmem:[#allocation6 + $0x1e0] sm:$0xff] }
  0x99   :  { %900 = vmatpush2.bf16.msra.mxu0 %v4899_v42  ;;  %957 = vmatmul.mubr.bf16.vlgmr.msra.gmra.mxu1 %v4944_v44  ;;  %v5016_v42 = vld [vmem:[#allocation4 + $0x188] ss:$16 sps:$4 sm:$0xff]   ;;  %v5021_v44 = vld [vmem:[#allocation4 + $0x164] ss:$16 sps:$4 sm:$0xff]  }
  0x9a   :  { %901 = vmatprep.subr.bf16.mxu0 %v4907_v43  ;;  %1386 = vmatpush1.bf16.msra.mxu1 %v4947_v59  ;;  %v5019_v43 = vld [vmem:[#allocation4 + $0x160] ss:$16 sps:$4 sm:$0xff]  }
  0x9b   :  { %1387 = vmatprep.subr.bf16.mxu1 %v4955_v63  ;;  %v5346_v59 = vld [vmem:[#allocation6 + $0x1c0] sm:$0xff] }
  0x9c   :  { %v4399_v63 = vcombine.high %v5346_v59, %v5348_v60 }
  0x9d   :  { %902 = vmatpush2.bf16.msra.mxu0 %v4905_v45  ;;  %v5022_v45 = vld [vmem:[#allocation4 + $0x168] ss:$16 sps:$4 sm:$0xff]  }
  0x9e   :  { %903 = vmatprep.subr.bf16.mxu0 %v4913_v46  ;;  %1388 = vmatpush1.bf16.msra.mxu1 %v4953_v1  ;;  %v5024_v46 = vld [vmem:[#allocation4 + $0x16c] ss:$16 sps:$4 sm:$0xff]  }
  0x9f   :  { %1389 = vmatprep.subr.bf16.mxu1 %v4961_v3 }
  0xa1   :  { %904 = vmatpush2.bf16.msra.mxu0 %v4911_v47  ;;  %v5027_v47 = vld [vmem:[#allocation4 + $0x144] ss:$16 sps:$4 sm:$0xff]  }
  0xa2   :  { %905 = vmatprep.subr.bf16.mxu0 %v4919_v48  ;;  %1390 = vmatpush1.bf16.msra.mxu1 %v4959_v4  ;;  %v5030_v48 = vld [vmem:[#allocation4 + $0x14c] ss:$16 sps:$4 sm:$0xff]  }
  0xa3   :  { %1391 = vmatprep.subr.bf16.mxu1 %v4967_v7 }
  0xa5   :  { %906 = vmatpush2.bf16.msra.mxu0 %v4917_v49  ;;  %v5025_v49 = vld [vmem:[#allocation4 + $0x140] ss:$16 sps:$4 sm:$0xff]  }
  0xa6   :  { %907 = vmatprep.subr.bf16.mxu0 %v4925_v50  ;;  %1392 = vmatpush1.bf16.msra.mxu1 %v4965_v9  ;;  %v5028_v50 = vld [vmem:[#allocation4 + $0x148] ss:$16 sps:$4 sm:$0xff]  }
  0xa7   :  { %1393 = vmatprep.subr.bf16.mxu1 %v4973_v11 }
  0xa9   :  { %908 = vmatpush2.bf16.msra.mxu0 %v4923_v51  ;;  %v5033_v51 = vld [vmem:[#allocation4 + $0x124] ss:$16 sps:$4 sm:$0xff]  }
  0xaa   :  { %909 = vmatprep.subr.bf16.mxu0 %v4931_v52  ;;  %1394 = vmatpush1.bf16.msra.mxu1 %v4971_v13  ;;  %v5036_v52 = vld [vmem:[#allocation4 + $0x12c] ss:$16 sps:$4 sm:$0xff]  }
  0xab   :  { %1395 = vmatprep.subr.bf16.mxu1 %v4979_v16 }
  0xad   :  { %910 = vmatpush2.bf16.msra.mxu0 %v4929_v53  ;;  %v5031_v53 = vld [vmem:[#allocation4 + $0x120] ss:$16 sps:$4 sm:$0xff]  }
  0xae   :  { %911 = vmatprep.subr.bf16.mxu0 %v4937_v54  ;;  %1396 = vmatpush1.bf16.msra.mxu1 %v4977_v15  ;;  %v5034_v54 = vld [vmem:[#allocation4 + $0x128] ss:$16 sps:$4 sm:$0xff]   ;;  %v206_v15 = vlaneseq }
  0xaf   :  { %1397 = vmatprep.subr.bf16.mxu1 %v4985_v19 }
  0xb0   :  { %v5362_v16 = vshrl.u32 %v206_v15, 7 }
  0xb1   :  { %912 = vmatpush2.bf16.msra.mxu0 %v4935_v55  ;;  %v5039_v55 = vld [vmem:[#allocation4 + $0x104] ss:$16 sps:$4 sm:$0xff]  }
  0xb2   :  { %913 = vmatprep.subr.bf16.mxu0 %v4943_v56  ;;  %1398 = vmatpush1.bf16.msra.mxu1 %v4983_v21  ;;  %v5042_v56 = vld [vmem:[#allocation4 + $0x10c] ss:$16 sps:$4 sm:$0xff]   ;;  %v5371_v19 = vsub.s32 1, %v5362_v16 }
  0xb3   :  { %1399 = vmatprep.subr.bf16.mxu1 %v4991_v23 }
  0xb5   :  { %914 = vmatpush2.bf16.msra.mxu0 %v4941_v57  ;;  %v5037_v57 = vld [vmem:[#allocation4 + $0x100] ss:$16 sps:$4 sm:$0xff]  }
  0xb6   :  { %1426 = vmatprep.subr.bf16.mxu0 %v4952_v62  ;;  %1400 = vmatpush1.bf16.msra.mxu1 %v4989_v25  ;;  %v4398_v62 = vcombine.low %v5346_v59, %v5348_v60 }
  0xb7   :  { %1401 = vmatprep.subr.bf16.mxu1 %v4997_v27 }
  0xb8   :  { %916 = vmatmul.mubr.bf16.vlgmr.msra.gmra.mxu0 %v4157_v58  ;;  %v5040_v58 = vld [vmem:[#allocation4 + $0x108] ss:$16 sps:$4 sm:$0xff]  }
  0xb9   :  { %1427 = vmatpush1.bf16.msra.mxu0 %v4950_v61  ;;  %v5350_v61 = vld [vmem:[#allocation6 + $0x5c0] sm:$0xff] }
  0xba   :  { %1428 = vmatprep.subr.bf16.mxu0 %v4958_v0  ;;  %1402 = vmatpush2.bf16.msra.mxu1 %v4995_v29  ;;  %v5356_v0 = vld [vmem:[#allocation6 + $0x5e0] sm:$0xff] }
  0xbb   :  { %1403 = vmatprep.subr.bf16.mxu1 %v5003_v31  ;;  %v4526_v1 = vcombine.low %v5350_v61, %v5356_v0 }
  0xbd   :  { %1429 = vmatpush1.bf16.msra.mxu0 %v4956_v2  ;;  %v4527_v2 = vcombine.high %v5350_v61, %v5356_v0  ;;  %v1519_v61 = vld [vmem:[#allocation6 + $0xc0] sm:$0xff] }
  0xbe   :  { %1430 = vmatprep.subr.bf16.mxu0 %v4964_v5  ;;  %1404 = vmatpush2.bf16.msra.mxu1 %v5001_v33  ;;  %v1647_v0 = vld [vmem:[#allocation6 + $0x4c0] sm:$0xff] }
  0xbf   :  { %1405 = vmatprep.subr.bf16.mxu1 %v5009_v35 }
  0xc1   :  { %1431 = vmatpush1.bf16.msra.mxu0 %v4962_v6 }
  0xc2   :  { %1432 = vmatprep.subr.bf16.mxu0 %v4970_v8  ;;  %1406 = vmatpush2.bf16.msra.mxu1 %v5007_v37 }
  0xc3   :  { %1407 = vmatprep.subr.bf16.mxu1 %v5015_v39 }
  0xc5   :  { %1433 = vmatpush1.bf16.msra.mxu0 %v4968_v10 }
  0xc6   :  { %1434 = vmatprep.subr.bf16.mxu0 %v4976_v12  ;;  %1408 = vmatpush2.bf16.msra.mxu1 %v5013_v41 }
  0xc7   :  { %1409 = vmatprep.subr.bf16.mxu1 %v5021_v44  ;;  %v1675_v44 = vld [vmem:[#allocation6 + $0x5a0] sm:$0xff] }
  0xc9   :  { %1435 = vmatpush1.bf16.msra.mxu0 %v4974_v14 }
  0xca   :  { %1436 = vmatprep.subr.bf16.mxu0 %v4982_v18  ;;  %1410 = vmatpush2.bf16.msra.mxu1 %v5019_v43  ;;  %v204_v18 = vld [vmem:[%s5469_s2] sm:$0x3] }
  0xcb   :  { %1411 = vmatprep.subr.bf16.mxu1 %v5027_v47  ;;  %v213_v21 = vrot.slane %v204_v18, %v5371_v19  ;;  %v1671_v43 = vld [vmem:[#allocation6 + $0x580] sm:$0xff] }
  0xcd   :  { %1437 = vmatpush1.bf16.msra.mxu0 %v4980_v17  ;;  %v5365_v17 = vsub.s32 0, %v5362_v16 }
  0xce   :  { %1438 = vmatprep.subr.bf16.mxu0 %v4988_v20  ;;  %1412 = vmatpush2.bf16.msra.mxu1 %v5025_v49  ;;  %v4519_v49 = vcombine.high %v1671_v43, %v1675_v44 }
  0xcf   :  { %1413 = vmatprep.subr.bf16.mxu1 %v5033_v51  ;;  %v209_v20 = vrot.slane %v204_v18, %v5365_v17  ;;  %v1539_v51 = vld [vmem:[#allocation6 + $0x160] sm:$0xff] }
  0xd1   :  { %1439 = vmatpush1.bf16.msra.mxu0 %v4986_v22 }
  0xd2   :  { %1440 = vmatprep.subr.bf16.mxu0 %v4994_v24  ;;  %1414 = vmatpush2.bf16.msra.mxu1 %v5031_v53  ;;  %v1667_v53 = vld [vmem:[#allocation6 + $0x560] sm:$0xff] }
  0xd3   :  { %1415 = vmatprep.subr.bf16.mxu1 %v5039_v55  ;;  %v4518_v55 = vcombine.low %v1671_v43, %v1675_v44  ;;  %v1747_v43 = vld [vmem:[#allocation6 + $0x7e0] sm:$0xff] }
  0xd5   :  { %1441 = vmatpush1.bf16.msra.mxu0 %v4992_v26 }
  0xd6   :  { %1442 = vmatprep.subr.bf16.mxu0 %v5000_v28  ;;  %1416 = vmatpush2.bf16.msra.mxu1 %v5037_v57 }
  0xd7   :  { %3073 = vmatprep.subr.bf16.mxu1 %v4399_v63  ;;  %v1531_v63 = vld [vmem:[#allocation6 + $0x120] sm:$0xff] }
  0xd9   :  { %1443 = vmatpush2.bf16.msra.mxu0 %v4998_v30 }
  0xda   :  { %1444 = vmatprep.subr.bf16.mxu0 %v5006_v32 }
  0xdd   :  { %1445 = vmatpush2.bf16.msra.mxu0 %v5004_v34 }
  0xde   :  { %1446 = vmatprep.subr.bf16.mxu0 %v5012_v36 }
  0xe1   :  { %1447 = vmatpush2.bf16.msra.mxu0 %v5010_v38 }
  0xe2   :  { %1448 = vmatprep.subr.bf16.mxu0 %v5018_v40  ;;  %v1543_v40 = vld [vmem:[#allocation6 + $0x180] sm:$0xff] }
  0xe5   :  { %1449 = vmatpush2.bf16.msra.mxu0 %v5016_v42  ;;  %v1547_v42 = vld [vmem:[#allocation6 + $0x1a0] sm:$0xff] }
  0xe6   :  { %1450 = vmatprep.subr.bf16.mxu0 %v5024_v46 }
  0xe9   :  { %1451 = vmatpush2.bf16.msra.mxu0 %v5022_v45 }
  0xea   :  { %1452 = vmatprep.subr.bf16.mxu0 %v5030_v48  ;;  %v4391_v48 = vcombine.high %v1543_v40, %v1547_v42 }
  0xed   :  { %1453 = vmatpush2.bf16.msra.mxu0 %v5028_v50  ;;  %v1535_v50 = vld [vmem:[#allocation6 + $0x140] sm:$0xff] }
  0xee   :  { %1454 = vmatprep.subr.bf16.mxu0 %v5036_v52  ;;  %v1663_v52 = vld [vmem:[#allocation6 + $0x540] sm:$0xff] }
  0xef   :  { %v4511_v57 = vcombine.high %v1663_v52, %v1667_v53 }
  0xf1   :  { %1455 = vmatpush2.bf16.msra.mxu0 %v5034_v54  ;;  %v4390_v54 = vcombine.low %v1543_v40, %v1547_v42  ;;  %v1619_v40 = vld [vmem:[#allocation6 + $0x3e0] sm:$0xff] }
  0xf2   :  { %1456 = vmatprep.subr.bf16.mxu0 %v5042_v56  ;;  %v4383_v56 = vcombine.high %v1535_v50, %v1539_v51 }
  0xf5   :  { %1457 = vmatpush2.bf16.msra.mxu0 %v5040_v58  ;;  %v1527_v58 = vld [vmem:[#allocation6 + $0x100] sm:$0xff] }
  0xf6   :  { %3114 = vmatprep.subr.bf16.mxu0 %v4527_v2  ;;  %v1655_v2 = vld [vmem:[#allocation6 + $0x500] sm:$0xff]  ;;  %v4375_v59 = vcombine.high %v1527_v58, %v1531_v63 }
 0x138   :  { %v835_v3 = vpop.f32.mrf.mxu0 }
 0x139   :  { %v876_v5 = vpop.f32.mrf.mxu1  ;;  %v836_v22 = vadd.f32 %v835_v3, %v209_v20  ;;  %v1659_v3 = vld [vmem:[#allocation6 + $0x520] sm:$0xff] }
 0x13a   :  { %v837_v4 = vpop.f32.mrf.mxu0  ;;  %v4503_v60 = vcombine.high %v1655_v2, %v1659_v3 }
 0x13b   :  { %v878_v7 = vpop.f32.mrf.mxu1  ;;  %v838_v23 = vadd.f32 %v837_v4, %v213_v21  ;;  %v877_v24 = vadd.f32 %v876_v5, %v836_v22  ;;  %v4382_v4 = vcombine.low %v1535_v50, %v1539_v51  ;;  %v4510_v5 = vcombine.low %v1663_v52, %v1667_v53  ;;  %v1503_v21 = vld [vmem:[#allocation6 + $0x40] sm:$0xff] }
 0x13c   :  { %v839_v6 = vpop.f32.mrf.mxu0  ;;  %v1507_v22 = vld [vmem:[#allocation6 + $0x60] sm:$0xff] }
 0x13d   :  { %v880_v9 = vpop.f32.mrf.mxu1  ;;  %v879_v26 = vadd.f32 %v878_v7, %v838_v23  ;;  %v4374_v6 = vcombine.low %v1527_v58, %v1531_v63  ;;  %v4502_v7 = vcombine.low %v1655_v2, %v1659_v3  ;;  %v1631_v23 = vld [vmem:[#allocation6 + $0x440] sm:$0xff] }
 0x13e   :  { %v840_v8 = vpop.f32.mrf.mxu0  ;;  %v1739_v51 = vld [vmem:[#allocation6 + $0x7a0] sm:$0xff] }
 0x13f   :  { %v881_v10 = vpop.f32.mrf.mxu1  ;;  %v1731_v63 = vld [vmem:[#allocation6 + $0x760] sm:$0xff] }
 0x140   :  { %v1511_v10 = vld [vmem:[#allocation6 + $0x80] sm:$0xff] }
 0x159   :  { %v958_v11 = vpop.f32.mrf.mxu1 }
 0x15b   :  { %v960_v12 = vpop.f32.mrf.mxu1 }
 0x15d   :  { %v962_v13 = vpop.f32.mrf.mxu1 }
 0x15e   :  { %v1643_v13 = vld [vmem:[#allocation6 + $0x4a0] sm:$0xff] }
 0x15f   :  { %v963_v14 = vpop.f32.mrf.mxu1 }
 0x178   :  { %v917_v25 = vpop.f32.mrf.mxu0 }
 0x179   :  { %v918_v27 = vadd.f32 %v917_v25, %v877_v24  ;;  %v1635_v24 = vld [vmem:[#allocation6 + $0x460] sm:$0xff] }
 0x17a   :  { %v919_v28 = vpop.f32.mrf.mxu0 }
 0x17b   :  { %v959_v29 = vadd.f32 %v958_v11, %v918_v27  ;;  %v920_v30 = vadd.f32 %v919_v28, %v879_v26  ;;  %v1515_v11 = vld [vmem:[#allocation6 + $0xa0] sm:$0xff]  ;;  %v4351_v27 = vcombine.high %v1503_v21, %v1507_v22  ;;  %v4479_v28 = vcombine.high %v1631_v23, %v1635_v24 }
 0x17c   :  { %v921_v31 = vpop.f32.mrf.mxu0  ;;  %v4359_v18 = vcombine.high %v1511_v10, %v1515_v11  ;;  %v4358_v25 = vcombine.low %v1511_v10, %v1515_v11  ;;  %v1715_v11 = vld [vmem:[#allocation6 + $0x6e0] sm:$0xff] }
 0x17d   :  { %v4272_v32 = vmul.f32 -1.442695, %v959_v29  ;;  %v961_v33 = vadd.f32 %v960_v12, %v920_v30  ;;  %v1639_v12 = vld [vmem:[#allocation6 + $0x480] sm:$0xff]  ;;  %v4350_v29 = vcombine.low %v1503_v21, %v1507_v22  ;;  %v4478_v30 = vcombine.low %v1631_v23, %v1635_v24 }
 0x17e   :  { %v922_v34 = vpop.f32.mrf.mxu0  ;;  %v4487_v20 = vcombine.high %v1639_v12, %v1643_v13  ;;  %v4486_v26 = vcombine.low %v1639_v12, %v1643_v13  ;;  %v1495_v31 = vld [vmem:[#allocation6] sm:$0xff] }
 0x17f   :  { %5107 = vpow2.f32 %v4272_v32  ;;  %v4273_v35 = vmul.f32 -1.442695, %v961_v33  ;;  %v1499_v32 = vld [vmem:[#allocation6 + $0x20] sm:$0xff] }
 0x180   :  { %v1623_v33 = vld [vmem:[#allocation6 + $0x400] sm:$0xff]  ;;  %v4343_v34 = vcombine.high %v1495_v31, %v1499_v32 }
 0x181   :  { %5109 = vpow2.f32 %v4273_v35  ;;  %v1627_v35 = vld [vmem:[#allocation6 + $0x420] sm:$0xff] }
 0x182   :  { %v1707_v23 = vld [vmem:[#allocation6 + $0x6a0] sm:$0xff] }
 0x183   :  { %v1567_v24 = vld [vmem:[#allocation6 + $0x240] sm:$0xff] }
 0x18c   :  { %v5108_v36 = vpop.eup %5107 }
 0x18d   :  { %v971_v37 = vadd.f32 1.0, %v5108_v36  ;;  %v4342_v36 = vcombine.low %v1495_v31, %v1499_v32  ;;  %v1559_v32 = vld [vmem:[#allocation6 + $0x200] sm:$0xff] }
 0x18e   :  { %v5110_v38 = vpop.eup %5109 }
 0x18f   :  { %v972_v39 = vadd.f32 1.0, %v5110_v38  ;;  %5111 = vrcp.f32 %v971_v37  ;;  %v4470_v37 = vcombine.low %v1623_v33, %v1627_v35  ;;  %v4471_v38 = vcombine.high %v1623_v33, %v1627_v35  ;;  %v1563_v33 = vld [vmem:[#allocation6 + $0x220] sm:$0xff] }
 0x190   :  { %v1691_v35 = vld [vmem:[#allocation6 + $0x620] sm:$0xff] }
 0x191   :  { %5113 = vrcp.f32 %v972_v39  ;;  %v1615_v39 = vld [vmem:[#allocation6 + $0x3c0] sm:$0xff] }
 0x192   :  { %v4463_v42 = vcombine.high %v1615_v39, %v1619_v40  ;;  %v4462_v44 = vcombine.low %v1615_v39, %v1619_v40  ;;  %v4406_v40 = vcombine.low %v1559_v32, %v1563_v33 }
 0x19c   :  { %v5112_v41 = vpop.eup %5111 }
 0x19d   :  { %v977_v47 = vpack.c.bf16 %v5112_v41, %v5112_v41  ;;  %v1743_v41 = vld [vmem:[#allocation6 + $0x7c0] sm:$0xff] }
 0x19e   :  { %v5114_v45 = vpop.eup %5113 }
 0x19f   :  { %v978_v46 = vpack.c.bf16 %v5114_v45, %v5114_v45  ;;  %v4590_v45 = vcombine.low %v1743_v41, %v1747_v43 }
 0x1a1   :  { %1417 = vmatprep.mubr.bf16.mxu1 %v978_v46  ;;  %1458 = vmatprep.mubr.bf16.mxu0 %v978_v46  ;;  %v4591_v46 = vcombine.high %v1743_v41, %v1747_v43  ;;  %v5383_v43 = vld [vmem:[#allocation6 + $0x1e8] sm:$0xff] }
 0x1a2   :  { %1418 = vmatmul.mubr.bf16.vlgmr.msra.gmra.mxu1 %v977_v47  ;;  %1459 = vmatmul.mubr.bf16.vlgmr.msra.gmra.mxu0 %v977_v47  ;;  %v1607_v47 = vld [vmem:[#allocation6 + $0x380] sm:$0xff] }
 0x1a3   :  { %3074 = vmatpush1.bf16.msra.mxu1 %v4398_v62  ;;  %3115 = vmatpush1.bf16.msra.mxu0 %v4526_v1  ;;  %v1523_v62 = vld [vmem:[#allocation6 + $0xe0] sm:$0xff] }
 0x1a4   :  { %3075 = vmatprep.subr.bf16.mxu1 %v4391_v48  ;;  %3116 = vmatprep.subr.bf16.mxu0 %v4519_v49  ;;  %v1651_v1 = vld [vmem:[#allocation6 + $0x4e0] sm:$0xff]  ;;  %v4367_v8 = vcombine.high %v1519_v61, %v1523_v62  ;;  %v4366_v14 = vcombine.low %v1519_v61, %v1523_v62 }
 0x1a5   :  { %v4495_v9 = vcombine.high %v1647_v0, %v1651_v1  ;;  %v4494_v15 = vcombine.low %v1647_v0, %v1651_v1  ;;  %v1611_v48 = vld [vmem:[#allocation6 + $0x3a0] sm:$0xff] }
 0x1a6   :  { %v1735_v49 = vld [vmem:[#allocation6 + $0x780] sm:$0xff]  ;;  %v4455_v50 = vcombine.high %v1607_v47, %v1611_v48  ;;  %v4454_v52 = vcombine.low %v1607_v47, %v1611_v48 }
 0x1a7   :  { %3076 = vmatpush1.bf16.msra.mxu1 %v4390_v54  ;;  %3117 = vmatpush1.bf16.msra.mxu0 %v4518_v55  ;;  %v4582_v53 = vcombine.low %v1735_v49, %v1739_v51  ;;  %v4583_v54 = vcombine.high %v1735_v49, %v1739_v51  ;;  %v1599_v55 = vld [vmem:[#allocation6 + $0x340] sm:$0xff] }
 0x1a8   :  { %3077 = vmatprep.subr.bf16.mxu1 %v4383_v56  ;;  %3118 = vmatprep.subr.bf16.mxu0 %v4511_v57  ;;  %v1603_v56 = vld [vmem:[#allocation6 + $0x360] sm:$0xff] }
 0x1a9   :  { %v1727_v57 = vld [vmem:[#allocation6 + $0x740] sm:$0xff]  ;;  %v4447_v58 = vcombine.high %v1599_v55, %v1603_v56  ;;  %v4446_v2 = vcombine.low %v1599_v55, %v1603_v56 }
 0x1aa   :  { %v4574_v3 = vcombine.low %v1727_v57, %v1731_v63  ;;  %v1723_v62 = vld [vmem:[#allocation6 + $0x720] sm:$0xff] }
 0x1ab   :  { %3078 = vmatpush1.bf16.msra.mxu1 %v4382_v4  ;;  %3119 = vmatpush1.bf16.msra.mxu0 %v4510_v5  ;;  %v4575_v4 = vcombine.high %v1727_v57, %v1731_v63  ;;  %v1591_v5 = vld [vmem:[#allocation6 + $0x300] sm:$0xff] }
 0x1ac   :  { %3079 = vmatprep.subr.bf16.mxu1 %v4375_v59  ;;  %3120 = vmatprep.subr.bf16.mxu0 %v4503_v60  ;;  %v1595_v59 = vld [vmem:[#allocation6 + $0x320] sm:$0xff] }
 0x1ad   :  { %v1719_v60 = vld [vmem:[#allocation6 + $0x700] sm:$0xff]  ;;  %v4439_v61 = vcombine.high %v1591_v5, %v1595_v59  ;;  %v4438_v0 = vcombine.low %v1591_v5, %v1595_v59 }
 0x1ae   :  { %v4566_v1 = vcombine.low %v1719_v60, %v1723_v62  ;;  %v1043_v51 = vld [vmem:[%s5471_s4] sm:$0xf] }
 0x1af   :  { %3080 = vmatpush1.bf16.msra.mxu1 %v4374_v6  ;;  %3121 = vmatpush1.bf16.msra.mxu0 %v4502_v7  ;;  %v4567_v6 = vcombine.high %v1719_v60, %v1723_v62  ;;  %v1583_v7 = vld [vmem:[#allocation6 + $0x2c0] sm:$0xff]  ;;  %v1052_v55 = vrot.slane %v1043_v51, %v5371_v19 }
 0x1b0   :  { %3081 = vmatprep.subr.bf16.mxu1 %v4367_v8  ;;  %3122 = vmatprep.subr.bf16.mxu0 %v4495_v9  ;;  %v1587_v8 = vld [vmem:[#allocation6 + $0x2e0] sm:$0xff] }
 0x1b1   :  { %v1711_v9 = vld [vmem:[#allocation6 + $0x6c0] sm:$0xff]  ;;  %v4431_v10 = vcombine.high %v1583_v7, %v1587_v8  ;;  %v4430_v12 = vcombine.low %v1583_v7, %v1587_v8 }
 0x1b2   :  { %v4558_v13 = vcombine.low %v1711_v9, %v1715_v11 }
 0x1b3   :  { %3082 = vmatpush1.bf16.msra.mxu1 %v4366_v14  ;;  %3123 = vmatpush1.bf16.msra.mxu0 %v4494_v15  ;;  %v4559_v14 = vcombine.high %v1711_v9, %v1715_v11  ;;  %v1575_v15 = vld [vmem:[#allocation6 + $0x280] sm:$0xff] }
 0x1b4   :  { %3083 = vmatprep.subr.bf16.mxu1 %v4359_v18  ;;  %3124 = vmatprep.subr.bf16.mxu0 %v4487_v20  ;;  %v1579_v18 = vld [vmem:[#allocation6 + $0x2a0] sm:$0xff] }
 0x1b5   :  { %v1703_v20 = vld [vmem:[#allocation6 + $0x680] sm:$0xff]  ;;  %v4422_v21 = vcombine.low %v1575_v15, %v1579_v18  ;;  %v4423_v22 = vcombine.high %v1575_v15, %v1579_v18 }
 0x1b7   :  { %3084 = vmatpush1.bf16.msra.mxu1 %v4358_v25  ;;  %3125 = vmatpush1.bf16.msra.mxu0 %v4486_v26  ;;  %v1571_v25 = vld [vmem:[#allocation6 + $0x260] sm:$0xff]  ;;  %v4550_v26 = vcombine.low %v1703_v20, %v1707_v23 }
 0x1b8   :  { %3085 = vmatprep.subr.bf16.mxu1 %v4351_v27  ;;  %3126 = vmatprep.subr.bf16.mxu0 %v4479_v28  ;;  %v4551_v27 = vcombine.high %v1703_v20, %v1707_v23  ;;  %v4415_v28 = vcombine.high %v1567_v24, %v1571_v25  ;;  %v1544_v23 = vld [vmem:[#allocation6 + $0x188] sm:$0xff] }
 0x1bb   :  { %3086 = vmatpush1.bf16.msra.mxu1 %v4350_v29  ;;  %3127 = vmatpush1.bf16.msra.mxu0 %v4478_v30  ;;  %v1695_v29 = vld [vmem:[#allocation6 + $0x640] sm:$0xff] }
 0x1bc   :  { %3087 = vmatprep.subr.bf16.mxu1 %v4343_v34  ;;  %3128 = vmatprep.subr.bf16.mxu0 %v4471_v38  ;;  %v1699_v30 = vld [vmem:[#allocation6 + $0x660] sm:$0xff]  ;;  %v4407_v38 = vcombine.high %v1559_v32, %v1563_v33  ;;  %v1536_v33 = vld [vmem:[#allocation6 + $0x148] sm:$0xff] }
 0x1bd   :  { %v4543_v31 = vcombine.high %v1695_v29, %v1699_v30  ;;  %v1687_v34 = vld [vmem:[#allocation6 + $0x600] sm:$0xff] }
 0x1be   :  { %v4535_v39 = vcombine.high %v1687_v34, %v1691_v35  ;;  %v4534_v41 = vcombine.low %v1687_v34, %v1691_v35  ;;  %v1540_v34 = vld [vmem:[#allocation6 + $0x168] sm:$0xff] }
 0x1bf   :  { %3088 = vmatpush1.bf16.msra.mxu1 %v4342_v36  ;;  %3129 = vmatpush1.bf16.msra.mxu0 %v4470_v37  ;;  %v4414_v36 = vcombine.low %v1567_v24, %v1571_v25  ;;  %v4542_v37 = vcombine.low %v1695_v29, %v1699_v30  ;;  %v1548_v24 = vld [vmem:[#allocation6 + $0x1a8] sm:$0xff] }
 0x1c0   :  { %3089 = vmatprep.subr.bf16.mxu1 %v4463_v42  ;;  %3130 = vmatprep.subr.bf16.mxu0 %v4591_v46  ;;  %v5381_v42 = vld [vmem:[#allocation6 + $0x1c8] sm:$0xff]  ;;  %v4393_v32 = vcombine.high %v1544_v23, %v1548_v24 }
 0x1c1   :  { %v5389_v46 = vld [vmem:[#allocation6 + $0x5e8] sm:$0xff]  ;;  %v4400_v47 = vcombine.low %v5381_v42, %v5383_v43 }
 0x1c3   :  { %3090 = vmatpush2.bf16.msra.mxu1 %v4462_v44  ;;  %3131 = vmatpush2.bf16.msra.mxu0 %v4590_v45  ;;  %v5385_v44 = vld [vmem:[#allocation6 + $0x5c8] sm:$0xff]  ;;  %v4401_v45 = vcombine.high %v5381_v42, %v5383_v43  ;;  %v4384_v42 = vcombine.low %v1536_v33, %v1540_v34 }
 0x1c4   :  { %3091 = vmatprep.subr.bf16.mxu1 %v4455_v50  ;;  %3132 = vmatprep.subr.bf16.mxu0 %v4583_v54  ;;  %v4528_v48 = vcombine.low %v5385_v44, %v5389_v46  ;;  %v4529_v49 = vcombine.high %v5385_v44, %v5389_v46  ;;  %v1055_v50 = vsub.s32 2, %v5362_v16 }
 0x1c6   :  { %v1056_v54 = vrot.slane %v1043_v51, %v1055_v50 }
 0x1c7   :  { %3092 = vmatpush2.bf16.msra.mxu1 %v4454_v52  ;;  %3133 = vmatpush2.bf16.msra.mxu0 %v4582_v53  ;;  %v1059_v52 = vsub.s32 3, %v5362_v16  ;;  %v1048_v53 = vrot.slane %v1043_v51, %v5365_v17 }
 0x1c8   :  { %3093 = vmatprep.subr.bf16.mxu1 %v4447_v58  ;;  %3134 = vmatprep.subr.bf16.mxu0 %v4575_v4 }
 0x1c9   :  { %v1060_v56 = vrot.slane %v1043_v51, %v1059_v52  ;;  %v1656_v51 = vld [vmem:[#allocation6 + $0x508] sm:$0xff] }
 0x1cb   :  { %3094 = vmatpush2.bf16.msra.mxu1 %v4446_v2  ;;  %3135 = vmatpush2.bf16.msra.mxu0 %v4574_v3 }
 0x1cc   :  { %3095 = vmatprep.subr.bf16.mxu1 %v4439_v61  ;;  %3136 = vmatprep.subr.bf16.mxu0 %v4567_v6 }
 0x1cf   :  { %3096 = vmatpush2.bf16.msra.mxu1 %v4438_v0  ;;  %3137 = vmatpush2.bf16.msra.mxu0 %v4566_v1 }
 0x1d0   :  { %3097 = vmatprep.subr.bf16.mxu1 %v4431_v10  ;;  %3138 = vmatprep.subr.bf16.mxu0 %v4559_v14 }
 0x1d3   :  { %3098 = vmatpush2.bf16.msra.mxu1 %v4430_v12  ;;  %3139 = vmatpush2.bf16.msra.mxu0 %v4558_v13 }
 0x1d4   :  { %3099 = vmatprep.subr.bf16.mxu1 %v4423_v22  ;;  %3140 = vmatprep.subr.bf16.mxu0 %v4551_v27  ;;  %v1672_v27 = vld [vmem:[#allocation6 + $0x588] sm:$0xff] }
 0x1d7   :  { %3100 = vmatpush2.bf16.msra.mxu1 %v4422_v21  ;;  %3141 = vmatpush2.bf16.msra.mxu0 %v4550_v26 }
 0x1d8   :  { %3101 = vmatprep.subr.bf16.mxu1 %v4415_v28  ;;  %3142 = vmatprep.subr.bf16.mxu0 %v4543_v31  ;;  %v1676_v28 = vld [vmem:[#allocation6 + $0x5a8] sm:$0xff] }
 0x1d9   :  { %v4521_v35 = vcombine.high %v1672_v27, %v1676_v28 }
 0x1db   :  { %3102 = vmatpush2.bf16.msra.mxu1 %v4414_v36  ;;  %3143 = vmatpush2.bf16.msra.mxu0 %v4542_v37  ;;  %v1664_v36 = vld [vmem:[#allocation6 + $0x548] sm:$0xff] }
 0x1dc   :  { %3103 = vmatprep.subr.bf16.mxu1 %v4407_v38  ;;  %3144 = vmatprep.subr.bf16.mxu0 %v4535_v39  ;;  %v1668_v37 = vld [vmem:[#allocation6 + $0x568] sm:$0xff]  ;;  %v4392_v38 = vcombine.low %v1544_v23, %v1548_v24  ;;  %v4520_v39 = vcombine.low %v1672_v27, %v1676_v28 }
 0x1dd   :  { %v4512_v43 = vcombine.low %v1664_v36, %v1668_v37  ;;  %v1616_v23 = vld [vmem:[#allocation6 + $0x3c8] sm:$0xff] }
 0x1de   :  { %v1620_v24 = vld [vmem:[#allocation6 + $0x3e8] sm:$0xff] }
 0x1df   :  { %3104 = vmatpush2.bf16.msra.mxu1 %v4406_v40  ;;  %3145 = vmatpush2.bf16.msra.mxu0 %v4534_v41  ;;  %v4385_v40 = vcombine.high %v1536_v33, %v1540_v34  ;;  %v4513_v41 = vcombine.high %v1664_v36, %v1668_v37  ;;  %v1748_v27 = vld [vmem:[#allocation6 + $0x7e8] sm:$0xff]  ;;  %v4465_v33 = vcombine.high %v1616_v23, %v1620_v24 }
 0x1e0   :  { %3155 = vmatprep.subr.bf16.mxu1 %v4401_v45  ;;  %3196 = vmatprep.subr.bf16.mxu0 %v4529_v49  ;;  %v1528_v45 = vld [vmem:[#allocation6 + $0x108] sm:$0xff] }
 0x1e1   :  { %v1532_v49 = vld [vmem:[#allocation6 + $0x128] sm:$0xff] }
 0x1e2   :  { %v4377_v44 = vcombine.high %v1528_v45, %v1532_v49  ;;  %v1612_v36 = vld [vmem:[#allocation6 + $0x3a8] sm:$0xff] }
 0x1e3   :  { %v1736_v37 = vld [vmem:[#allocation6 + $0x788] sm:$0xff] }
 0x262   :  { %v1419_v57 = vpop.f32.mrf.mxu1  ;;  %v1460_v58 = vpop.f32.mrf.mxu0 }
 0x263   :  { %v1420_v63 = vadd.f32 %v1419_v57, %v1048_v53  ;;  %v1461_v2 = vadd.f32 %v1460_v58, %v1056_v54  ;;  %v1660_v53 = vld [vmem:[#allocation6 + $0x528] sm:$0xff] }
 0x264   :  { %v1421_v3 = vpop.f32.mrf.mxu1  ;;  %v1462_v4 = vpop.f32.mrf.mxu0  ;;  %v4505_v46 = vcombine.high %v1656_v51, %v1660_v53  ;;  %v1648_v54 = vld [vmem:[#allocation6 + $0x4c8] sm:$0xff]  ;;  %v4504_v57 = vcombine.low %v1656_v51, %v1660_v53 }
 0x265   :  { %v4338_v5 = vmul.f32 -1.442695, %v1420_v63  ;;  %v4340_v59 = vmul.f32 -1.442695, %v1461_v2  ;;  %v1422_v60 = vadd.f32 %v1421_v3, %v1052_v55  ;;  %v1463_v61 = vadd.f32 %v1462_v4, %v1060_v56  ;;  %v1652_v55 = vld [vmem:[#allocation6 + $0x4e8] sm:$0xff] }
 0x266   :  { %v1423_v62 = vpop.f32.mrf.mxu1  ;;  %v1464_v0 = vpop.f32.mrf.mxu0  ;;  %v4376_v56 = vcombine.low %v1528_v45, %v1532_v49  ;;  %v4497_v63 = vcombine.high %v1648_v54, %v1652_v55  ;;  %v1512_v2 = vld [vmem:[#allocation6 + $0x88] sm:$0xff] }
 0x267   :  { %5115 = vpow2.f32 %v4338_v5  ;;  %v4339_v1 = vmul.f32 -1.442695, %v1422_v60  ;;  %v4341_v6 = vmul.f32 -1.442695, %v1463_v61  ;;  %v1516_v3 = vld [vmem:[#allocation6 + $0xa8] sm:$0xff]  ;;  %v4496_v60 = vcombine.low %v1648_v54, %v1652_v55 }
 0x268   :  { %5117 = vpow2.f32 %v4340_v59  ;;  %v1424_v7 = vpop.f32.mrf.mxu1  ;;  %v1465_v8 = vpop.f32.mrf.mxu0  ;;  %v1640_v4 = vld [vmem:[#allocation6 + $0x488] sm:$0xff]  ;;  %v4361_v61 = vcombine.high %v1512_v2, %v1516_v3 }
 0x269   :  { %5119 = vpow2.f32 %v4339_v1  ;;  %v1644_v5 = vld [vmem:[#allocation6 + $0x4a8] sm:$0xff]  ;;  %v4360_v8 = vcombine.low %v1512_v2, %v1516_v3 }
 0x26a   :  { %5121 = vpow2.f32 %v4341_v6  ;;  %v4489_v62 = vcombine.high %v1640_v4, %v1644_v5  ;;  %v1504_v0 = vld [vmem:[#allocation6 + $0x48] sm:$0xff] }
 0x26b   :  { %v1508_v1 = vld [vmem:[#allocation6 + $0x68] sm:$0xff] }
 0x26c   :  { %v1632_v6 = vld [vmem:[#allocation6 + $0x448] sm:$0xff] }
 0x26d   :  { %v1636_v7 = vld [vmem:[#allocation6 + $0x468] sm:$0xff] }
 0x26e   :  { %v1600_v49 = vld [vmem:[#allocation6 + $0x348] sm:$0xff] }
 0x26f   :  { %v1604_v51 = vld [vmem:[#allocation6 + $0x368] sm:$0xff] }
 0x270   :  { %v1728_v53 = vld [vmem:[#allocation6 + $0x748] sm:$0xff] }
 0x271   :  { %v1596_v54 = vld [vmem:[#allocation6 + $0x328] sm:$0xff] }
 0x272   :  { %v1720_v55 = vld [vmem:[#allocation6 + $0x708] sm:$0xff] }
 0x273   :  { %v1584_v3 = vld [vmem:[#allocation6 + $0x2c8] sm:$0xff] }
 0x274   :  { %v5116_v9 = vpop.eup %5115 }
 0x275   :  { %v5118_v10 = vpop.eup %5117  ;;  %v1479_v11 = vadd.f32 1.0, %v5116_v9  ;;  %v4488_v9 = vcombine.low %v1640_v4, %v1644_v5  ;;  %v1588_v4 = vld [vmem:[#allocation6 + $0x2e8] sm:$0xff] }
 0x276   :  { %v5120_v12 = vpop.eup %5119  ;;  %v1481_v13 = vadd.f32 1.0, %v5118_v10  ;;  %v4353_v10 = vcombine.high %v1504_v0, %v1508_v1  ;;  %v1712_v5 = vld [vmem:[#allocation6 + $0x6c8] sm:$0xff] }
 0x277   :  { %v5122_v14 = vpop.eup %5121  ;;  %5123 = vrcp.f32 %v1479_v11  ;;  %v1480_v15 = vadd.f32 1.0, %v5120_v12  ;;  %v4481_v11 = vcombine.high %v1632_v6, %v1636_v7  ;;  %v1496_v12 = vld [vmem:[#allocation6 + $0x8] sm:$0xff] }
 0x278   :  { %5125 = vrcp.f32 %v1481_v13  ;;  %v1482_v18 = vadd.f32 1.0, %v5122_v14  ;;  %v1500_v13 = vld [vmem:[#allocation6 + $0x28] sm:$0xff] }
 0x279   :  { %5127 = vrcp.f32 %v1480_v15  ;;  %v1624_v14 = vld [vmem:[#allocation6 + $0x408] sm:$0xff]  ;;  %v4344_v28 = vcombine.low %v1496_v12, %v1500_v13 }
 0x27a   :  { %5129 = vrcp.f32 %v1482_v18  ;;  %v1628_v15 = vld [vmem:[#allocation6 + $0x428] sm:$0xff]  ;;  %v4352_v18 = vcombine.low %v1504_v0, %v1508_v1 }
 0x27b   :  { %v1576_v1 = vld [vmem:[#allocation6 + $0x288] sm:$0xff] }
 0x284   :  { %v5124_v20 = vpop.eup %5123 }
 0x285   :  { %v5126_v21 = vpop.eup %5125  ;;  %v5412_v30 = vpack.c.bf16 %v5124_v20, %v5124_v20  ;;  %v4480_v20 = vcombine.low %v1632_v6, %v1636_v7  ;;  %v1580_v6 = vld [vmem:[#allocation6 + $0x2a8] sm:$0xff] }
 0x286   :  { %v5128_v22 = vpop.eup %5127  ;;  %v5415_v31 = vpack.c.bf16 %v5126_v21, %v5126_v21  ;;  %v4345_v21 = vcombine.high %v1496_v12, %v1500_v13  ;;  %v1704_v7 = vld [vmem:[#allocation6 + $0x688] sm:$0xff] }
 0x287   :  { %v5130_v25 = vpop.eup %5129  ;;  %v5408_v26 = vpack.c.bf16 %v5128_v22, %v5128_v22  ;;  %v4473_v22 = vcombine.high %v1624_v14, %v1628_v15  ;;  %v1568_v13 = vld [vmem:[#allocation6 + $0x248] sm:$0xff] }
 0x288   :  { %v5410_v29 = vpack.c.bf16 %v5130_v25, %v5130_v25  ;;  %v1744_v25 = vld [vmem:[#allocation6 + $0x7c8] sm:$0xff] }
 0x289   :  { %3105 = vmatprep.mubr.bf16.mxu1 %v5408_v26  ;;  %v4593_v34 = vcombine.high %v1744_v25, %v1748_v27 }
 0x28a   :  { %3146 = vmatprep.mubr.bf16.mxu0 %v5410_v29  ;;  %3106 = vmatmul.mubr.bf16.vlgmr.msra.gmra.mxu1 %v5412_v30 }
 0x28b   :  { %3147 = vmatmul.mubr.bf16.vlgmr.msra.gmra.mxu0 %v5415_v31  ;;  %3156 = vmatpush1.bf16.msra.mxu1 %v4400_v47  ;;  %v1520_v47 = vld [vmem:[#allocation6 + $0xc8] sm:$0xff] }
 0x28c   :  { %3197 = vmatpush1.bf16.msra.mxu0 %v4528_v48  ;;  %3187 = vmatprep.mubr.bf16.mxu1 %v5408_v26  ;;  %v1524_v48 = vld [vmem:[#allocation6 + $0xe8] sm:$0xff] }
 0x28d   :  { %3228 = vmatprep.mubr.bf16.mxu0 %v5410_v29  ;;  %3157 = vmatprep.subr.bf16.mxu1 %v4393_v32  ;;  %v4369_v58 = vcombine.high %v1520_v47, %v1524_v48  ;;  %v4368_v59 = vcombine.low %v1520_v47, %v1524_v48  ;;  %v4472_v32 = vcombine.low %v1624_v14, %v1628_v15  ;;  %v1592_v48 = vld [vmem:[#allocation6 + $0x308] sm:$0xff] }
 0x28e   :  { %3198 = vmatprep.subr.bf16.mxu0 %v4521_v35  ;;  %v1608_v35 = vld [vmem:[#allocation6 + $0x388] sm:$0xff] }
 0x28f   :  { %3158 = vmatpush1.bf16.msra.mxu1 %v4392_v38  ;;  %v1740_v38 = vld [vmem:[#allocation6 + $0x7a8] sm:$0xff] }
 0x290   :  { %3199 = vmatpush1.bf16.msra.mxu0 %v4520_v39  ;;  %3159 = vmatprep.subr.bf16.mxu1 %v4385_v40  ;;  %v4464_v39 = vcombine.low %v1616_v23, %v1620_v24  ;;  %v4592_v40 = vcombine.low %v1744_v25, %v1748_v27  ;;  %v4585_v45 = vcombine.high %v1736_v37, %v1740_v38  ;;  %v1572_v14 = vld [vmem:[#allocation6 + $0x268] sm:$0xff] }
 0x291   :  { %3200 = vmatprep.subr.bf16.mxu0 %v4513_v41  ;;  %v4457_v41 = vcombine.high %v1608_v35, %v1612_v36  ;;  %v1696_v15 = vld [vmem:[#allocation6 + $0x648] sm:$0xff] }
 0x292   :  { %v1560_v24 = vld [vmem:[#allocation6 + $0x208] sm:$0xff] }
 0x293   :  { %3160 = vmatpush1.bf16.msra.mxu1 %v4384_v42  ;;  %v1732_v42 = vld [vmem:[#allocation6 + $0x768] sm:$0xff] }
 0x294   :  { %3201 = vmatpush1.bf16.msra.mxu0 %v4512_v43  ;;  %3161 = vmatprep.subr.bf16.mxu1 %v4377_v44  ;;  %v4456_v43 = vcombine.low %v1608_v35, %v1612_v36  ;;  %v4584_v44 = vcombine.low %v1736_v37, %v1740_v38  ;;  %v4577_v47 = vcombine.high %v1728_v53, %v1732_v42  ;;  %v1564_v25 = vld [vmem:[#allocation6 + $0x228] sm:$0xff]  ;;  %v1553_v36 = vld [vmem:[#allocation6 + $0x1d0] sm:$0xff] }
 0x295   :  { %3202 = vmatprep.subr.bf16.mxu0 %v4505_v46  ;;  %v4449_v46 = vcombine.high %v1600_v49, %v1604_v51  ;;  %v1688_v27 = vld [vmem:[#allocation6 + $0x608] sm:$0xff]  ;;  %v1557_v37 = vld [vmem:[#allocation6 + $0x1f0] sm:$0xff] }
 0x296   :  { %v1681_v38 = vld [vmem:[#allocation6 + $0x5d0] sm:$0xff] }
 0x297   :  { %3162 = vmatpush1.bf16.msra.mxu1 %v4376_v56  ;;  %v1724_v56 = vld [vmem:[#allocation6 + $0x728] sm:$0xff] }
 0x298   :  { %3203 = vmatpush1.bf16.msra.mxu0 %v4504_v57  ;;  %3163 = vmatprep.subr.bf16.mxu1 %v4369_v58  ;;  %v4448_v57 = vcombine.low %v1600_v49, %v1604_v51  ;;  %v4576_v58 = vcombine.low %v1728_v53, %v1732_v42  ;;  %v4569_v2 = vcombine.high %v1720_v55, %v1724_v56  ;;  %v1545_v51 = vld [vmem:[#allocation6 + $0x190] sm:$0xff] }
 0x299   :  { %3204 = vmatprep.subr.bf16.mxu0 %v4497_v63  ;;  %v4441_v63 = vcombine.high %v1592_v48, %v1596_v54  ;;  %v1549_v53 = vld [vmem:[#allocation6 + $0x1b0] sm:$0xff]  ;;  %v4402_v42 = vcombine.low %v1553_v36, %v1557_v37 }
 0x29b   :  { %3164 = vmatpush1.bf16.msra.mxu1 %v4368_v59  ;;  %v1716_v59 = vld [vmem:[#allocation6 + $0x6e8] sm:$0xff] }
 0x29c   :  { %3205 = vmatpush1.bf16.msra.mxu0 %v4496_v60  ;;  %3165 = vmatprep.subr.bf16.mxu1 %v4361_v61  ;;  %v4440_v60 = vcombine.low %v1592_v48, %v1596_v54  ;;  %v4568_v61 = vcombine.low %v1720_v55, %v1724_v56  ;;  %v4561_v0 = vcombine.high %v1712_v5, %v1716_v59  ;;  %v1537_v48 = vld [vmem:[#allocation6 + $0x150] sm:$0xff] }
 0x29d   :  { %3206 = vmatprep.subr.bf16.mxu0 %v4489_v62  ;;  %v4433_v62 = vcombine.high %v1584_v3, %v1588_v4  ;;  %v1541_v54 = vld [vmem:[#allocation6 + $0x170] sm:$0xff] }
 0x29e   :  { %v1665_v56 = vld [vmem:[#allocation6 + $0x550] sm:$0xff] }
 0x29f   :  { %3166 = vmatpush1.bf16.msra.mxu1 %v4360_v8  ;;  %v1708_v8 = vld [vmem:[#allocation6 + $0x6a8] sm:$0xff] }
 0x2a0   :  { %3207 = vmatpush1.bf16.msra.mxu0 %v4488_v9  ;;  %3167 = vmatprep.subr.bf16.mxu1 %v4353_v10  ;;  %v4432_v9 = vcombine.low %v1584_v3, %v1588_v4  ;;  %v4560_v10 = vcombine.low %v1712_v5, %v1716_v59  ;;  %v4553_v12 = vcombine.high %v1704_v7, %v1708_v8  ;;  %v1529_v4 = vld [vmem:[#allocation6 + $0x110] sm:$0xff] }
 0x2a1   :  { %3208 = vmatprep.subr.bf16.mxu0 %v4481_v11  ;;  %v4425_v11 = vcombine.high %v1576_v1, %v1580_v6  ;;  %v1533_v5 = vld [vmem:[#allocation6 + $0x130] sm:$0xff] }
 0x2a2   :  { %v1657_v59 = vld [vmem:[#allocation6 + $0x510] sm:$0xff] }
 0x2a3   :  { %3168 = vmatpush1.bf16.msra.mxu1 %v4352_v18  ;;  %v1700_v18 = vld [vmem:[#allocation6 + $0x668] sm:$0xff] }
 0x2a4   :  { %3209 = vmatpush1.bf16.msra.mxu0 %v4480_v20  ;;  %3169 = vmatprep.subr.bf16.mxu1 %v4345_v21  ;;  %v4424_v20 = vcombine.low %v1576_v1, %v1580_v6  ;;  %v4552_v21 = vcombine.low %v1704_v7, %v1708_v8  ;;  %v4545_v23 = vcombine.high %v1696_v15, %v1700_v18  ;;  %v1521_v6 = vld [vmem:[#allocation6 + $0xd0] sm:$0xff] }
 0x2a5   :  { %3210 = vmatprep.subr.bf16.mxu0 %v4473_v22  ;;  %v4417_v22 = vcombine.high %v1568_v13, %v1572_v14  ;;  %v1525_v7 = vld [vmem:[#allocation6 + $0xf0] sm:$0xff] }
 0x2a6   :  { %v1649_v8 = vld [vmem:[#allocation6 + $0x4d0] sm:$0xff] }
 0x2a7   :  { %3170 = vmatpush1.bf16.msra.mxu1 %v4344_v28  ;;  %v1692_v28 = vld [vmem:[#allocation6 + $0x628] sm:$0xff] }
 0x2a8   :  { %3211 = vmatpush1.bf16.msra.mxu0 %v4472_v32  ;;  %3171 = vmatprep.subr.bf16.mxu1 %v4465_v33  ;;  %v4416_v32 = vcombine.low %v1568_v13, %v1572_v14  ;;  %v4544_v33 = vcombine.low %v1696_v15, %v1700_v18  ;;  %v4537_v35 = vcombine.high %v1688_v27, %v1692_v28  ;;  %v1513_v14 = vld [vmem:[#allocation6 + $0x90] sm:$0xff] }
 0x2a9   :  { %3212 = vmatprep.subr.bf16.mxu0 %v4593_v34  ;;  %v4409_v34 = vcombine.high %v1560_v24, %v1564_v25  ;;  %v1517_v15 = vld [vmem:[#allocation6 + $0xb0] sm:$0xff] }
 0x2aa   :  { %v1641_v18 = vld [vmem:[#allocation6 + $0x490] sm:$0xff] }
 0x2ab   :  { %3172 = vmatpush2.bf16.msra.mxu1 %v4464_v39  ;;  %v1685_v39 = vld [vmem:[#allocation6 + $0x5f0] sm:$0xff] }
 0x2ac   :  { %3213 = vmatpush2.bf16.msra.mxu0 %v4592_v40  ;;  %3173 = vmatprep.subr.bf16.mxu1 %v4457_v41  ;;  %v4408_v40 = vcombine.low %v1560_v24, %v1564_v25  ;;  %v4536_v41 = vcombine.low %v1688_v27, %v1692_v28  ;;  %v4531_v49 = vcombine.high %v1681_v38, %v1685_v39  ;;  %v1505_v25 = vld [vmem:[#allocation6 + $0x50] sm:$0xff] }
 0x2ad   :  { %3214 = vmatprep.subr.bf16.mxu0 %v4585_v45  ;;  %v4403_v45 = vcombine.high %v1553_v36, %v1557_v37  ;;  %v1509_v27 = vld [vmem:[#allocation6 + $0x70] sm:$0xff] }
 0x2ae   :  { %v1633_v28 = vld [vmem:[#allocation6 + $0x450] sm:$0xff] }
 0x2af   :  { %3174 = vmatpush2.bf16.msra.mxu1 %v4456_v43  ;;  %v1673_v43 = vld [vmem:[#allocation6 + $0x590] sm:$0xff] }
 0x2b0   :  { %3215 = vmatpush2.bf16.msra.mxu0 %v4584_v44  ;;  %3175 = vmatprep.subr.bf16.mxu1 %v4449_v46  ;;  %v1677_v44 = vld [vmem:[#allocation6 + $0x5b0] sm:$0xff]  ;;  %v4530_v46 = vcombine.low %v1681_v38, %v1685_v39 }
 0x2b1   :  { %3216 = vmatprep.subr.bf16.mxu0 %v4577_v47  ;;  %v4395_v47 = vcombine.high %v1545_v51, %v1549_v53  ;;  %v4523_v55 = vcombine.high %v1673_v43, %v1677_v44  ;;  %v1497_v37 = vld [vmem:[#allocation6 + $0x10] sm:$0xff] }
 0x2b2   :  { %v1501_v38 = vld [vmem:[#allocation6 + $0x30] sm:$0xff] }
 0x2b3   :  { %3176 = vmatpush2.bf16.msra.mxu1 %v4448_v57  ;;  %v1669_v57 = vld [vmem:[#allocation6 + $0x570] sm:$0xff] }
 0x2b4   :  { %3217 = vmatpush2.bf16.msra.mxu0 %v4576_v58  ;;  %3177 = vmatprep.subr.bf16.mxu1 %v4441_v63  ;;  %v4394_v58 = vcombine.low %v1545_v51, %v1549_v53  ;;  %v4522_v63 = vcombine.low %v1673_v43, %v1677_v44  ;;  %v4515_v3 = vcombine.high %v1665_v56, %v1669_v57  ;;  %v1625_v39 = vld [vmem:[#allocation6 + $0x410] sm:$0xff] }
 0x2b5   :  { %3218 = vmatprep.subr.bf16.mxu0 %v4569_v2  ;;  %v4387_v2 = vcombine.high %v1537_v48, %v1541_v54  ;;  %v1617_v53 = vld [vmem:[#allocation6 + $0x3d0] sm:$0xff] }
 0x2b6   :  { %v1745_v43 = vld [vmem:[#allocation6 + $0x7d0] sm:$0xff] }
 0x2b7   :  { %3178 = vmatpush2.bf16.msra.mxu1 %v4440_v60  ;;  %v1661_v60 = vld [vmem:[#allocation6 + $0x530] sm:$0xff] }
 0x2b8   :  { %3219 = vmatpush2.bf16.msra.mxu0 %v4568_v61  ;;  %3179 = vmatprep.subr.bf16.mxu1 %v4433_v62  ;;  %v4386_v61 = vcombine.low %v1537_v48, %v1541_v54  ;;  %v4514_v62 = vcombine.low %v1665_v56, %v1669_v57  ;;  %v4507_v1 = vcombine.high %v1657_v59, %v1661_v60  ;;  %v1749_v44 = vld [vmem:[#allocation6 + $0x7f0] sm:$0xff] }
 0x2b9   :  { %3220 = vmatprep.subr.bf16.mxu0 %v4561_v0  ;;  %v4379_v0 = vcombine.high %v1529_v4, %v1533_v5  ;;  %v4595_v54 = vcombine.high %v1745_v43, %v1749_v44  ;;  %v1613_v56 = vld [vmem:[#allocation6 + $0x3b0] sm:$0xff] }
 0x2ba   :  { %v1737_v57 = vld [vmem:[#allocation6 + $0x790] sm:$0xff] }
 0x2bb   :  { %3180 = vmatpush2.bf16.msra.mxu1 %v4432_v9  ;;  %v1653_v9 = vld [vmem:[#allocation6 + $0x4f0] sm:$0xff] }
 0x2bc   :  { %3221 = vmatpush2.bf16.msra.mxu0 %v4560_v10  ;;  %3181 = vmatprep.subr.bf16.mxu1 %v4425_v11  ;;  %v4378_v10 = vcombine.low %v1529_v4, %v1533_v5  ;;  %v4506_v11 = vcombine.low %v1657_v59, %v1661_v60  ;;  %v4499_v13 = vcombine.high %v1649_v8, %v1653_v9  ;;  %v1601_v5 = vld [vmem:[#allocation6 + $0x350] sm:$0xff] }
 0x2bd   :  { %3222 = vmatprep.subr.bf16.mxu0 %v4553_v12  ;;  %v4371_v12 = vcombine.high %v1521_v6, %v1525_v7  ;;  %v1605_v59 = vld [vmem:[#allocation6 + $0x370] sm:$0xff] }
 0x2be   :  { %v1729_v60 = vld [vmem:[#allocation6 + $0x750] sm:$0xff] }
 0x2bf   :  { %3182 = vmatpush2.bf16.msra.mxu1 %v4424_v20  ;;  %v1645_v20 = vld [vmem:[#allocation6 + $0x4b0] sm:$0xff] }
 0x2c0   :  { %3223 = vmatpush2.bf16.msra.mxu0 %v4552_v21  ;;  %3183 = vmatprep.subr.bf16.mxu1 %v4417_v22  ;;  %v4370_v21 = vcombine.low %v1521_v6, %v1525_v7  ;;  %v4498_v22 = vcombine.low %v1649_v8, %v1653_v9  ;;  %v4491_v24 = vcombine.high %v1641_v18, %v1645_v20  ;;  %v1593_v7 = vld [vmem:[#allocation6 + $0x310] sm:$0xff] }
 0x2c1   :  { %3224 = vmatprep.subr.bf16.mxu0 %v4545_v23  ;;  %v4363_v23 = vcombine.high %v1513_v14, %v1517_v15  ;;  %v1597_v8 = vld [vmem:[#allocation6 + $0x330] sm:$0xff] }
 0x2c2   :  { %v1721_v9 = vld [vmem:[#allocation6 + $0x710] sm:$0xff] }
 0x2c3   :  { %3184 = vmatpush2.bf16.msra.mxu1 %v4416_v32  ;;  %v1637_v32 = vld [vmem:[#allocation6 + $0x470] sm:$0xff] }
 0x2c4   :  { %3225 = vmatpush2.bf16.msra.mxu0 %v4544_v33  ;;  %3185 = vmatprep.subr.bf16.mxu1 %v4409_v34  ;;  %v4362_v33 = vcombine.low %v1513_v14, %v1517_v15  ;;  %v4490_v34 = vcombine.low %v1641_v18, %v1645_v20  ;;  %v4483_v36 = vcombine.high %v1633_v28, %v1637_v32  ;;  %v1585_v15 = vld [vmem:[#allocation6 + $0x2d0] sm:$0xff] }
 0x2c5   :  { %3226 = vmatprep.subr.bf16.mxu0 %v4537_v35  ;;  %v4355_v35 = vcombine.high %v1505_v25, %v1509_v27  ;;  %v1589_v18 = vld [vmem:[#allocation6 + $0x2f0] sm:$0xff] }
 0x2c6   :  { %v1713_v20 = vld [vmem:[#allocation6 + $0x6d0] sm:$0xff] }
 0x2c7   :  { %3186 = vmatpush2.bf16.msra.mxu1 %v4408_v40  ;;  %v1629_v40 = vld [vmem:[#allocation6 + $0x430] sm:$0xff] }
 0x2c8   :  { %3227 = vmatpush2.bf16.msra.mxu0 %v4536_v41  ;;  %3237 = vmatprep.subr.bf16.mxu1 %v4403_v45  ;;  %v4354_v41 = vcombine.low %v1505_v25, %v1509_v27  ;;  %v4482_v45 = vcombine.low %v1633_v28, %v1637_v32  ;;  %v4475_v51 = vcombine.high %v1625_v39, %v1629_v40  ;;  %v1577_v27 = vld [vmem:[#allocation6 + $0x290] sm:$0xff] }
 0x2c9   :  { %3278 = vmatprep.subr.bf16.mxu0 %v4531_v49  ;;  %v4347_v49 = vcombine.high %v1497_v37, %v1501_v38  ;;  %v1581_v28 = vld [vmem:[#allocation6 + $0x2b0] sm:$0xff] }
 0x2ca   :  { %3188 = vmatmul.mubr.bf16.vlgmr.msra.gmra.mxu1 %v5412_v30  ;;  %v1705_v32 = vld [vmem:[#allocation6 + $0x690] sm:$0xff] }
 0x2cb   :  { %3229 = vmatmul.mubr.bf16.vlgmr.msra.gmra.mxu0 %v5415_v31  ;;  %3238 = vmatpush1.bf16.msra.mxu1 %v4402_v42  ;;  %v1621_v42 = vld [vmem:[#allocation6 + $0x3f0] sm:$0xff] }
 0x2cc   :  { %3269 = vmatprep.mubr.bf16.mxu1 %v5408_v26  ;;  %3279 = vmatpush1.bf16.msra.mxu0 %v4530_v46  ;;  %v4346_v46 = vcombine.low %v1497_v37, %v1501_v38  ;;  %v4467_v48 = vcombine.high %v1617_v53, %v1621_v42  ;;  %v1569_v38 = vld [vmem:[#allocation6 + $0x250] sm:$0xff] }
 0x2cd   :  { %3310 = vmatprep.mubr.bf16.mxu0 %v5410_v29  ;;  %3239 = vmatprep.subr.bf16.mxu1 %v4395_v47  ;;  %v4474_v47 = vcombine.low %v1625_v39, %v1629_v40  ;;  %v1573_v39 = vld [vmem:[#allocation6 + $0x270] sm:$0xff] }
 0x2ce   :  { %3280 = vmatprep.subr.bf16.mxu0 %v4523_v55  ;;  %v1609_v55 = vld [vmem:[#allocation6 + $0x390] sm:$0xff] }
 0x2cf   :  { %3240 = vmatpush1.bf16.msra.mxu1 %v4394_v58  ;;  %v1741_v58 = vld [vmem:[#allocation6 + $0x7b0] sm:$0xff] }
 0x2d0   :  { %3281 = vmatpush1.bf16.msra.mxu0 %v4522_v63  ;;  %3241 = vmatprep.subr.bf16.mxu1 %v4387_v2  ;;  %v4466_v63 = vcombine.low %v1617_v53, %v1621_v42  ;;  %v4594_v2 = vcombine.low %v1745_v43, %v1749_v44  ;;  %v4587_v4 = vcombine.high %v1737_v57, %v1741_v58  ;;  %v1697_v40 = vld [vmem:[#allocation6 + $0x650] sm:$0xff] }
 0x2d1   :  { %3282 = vmatprep.subr.bf16.mxu0 %v4515_v3  ;;  %v4459_v3 = vcombine.high %v1609_v55, %v1613_v56  ;;  %v1561_v42 = vld [vmem:[#allocation6 + $0x210] sm:$0xff] }
 0x2d2   :  { %v1565_v43 = vld [vmem:[#allocation6 + $0x230] sm:$0xff] }
 0x2d3   :  { %3242 = vmatpush1.bf16.msra.mxu1 %v4386_v61  ;;  %v1733_v61 = vld [vmem:[#allocation6 + $0x770] sm:$0xff] }
 0x2d4   :  { %3283 = vmatpush1.bf16.msra.mxu0 %v4514_v62  ;;  %3243 = vmatprep.subr.bf16.mxu1 %v4379_v0  ;;  %v4458_v62 = vcombine.low %v1609_v55, %v1613_v56  ;;  %v4586_v0 = vcombine.low %v1737_v57, %v1741_v58  ;;  %v4579_v6 = vcombine.high %v1729_v60, %v1733_v61  ;;  %v1689_v44 = vld [vmem:[#allocation6 + $0x610] sm:$0xff]  ;;  %v1554_v56 = vld [vmem:[#allocation6 + $0x1d8] sm:$0xff] }
 0x2d5   :  { %3284 = vmatprep.subr.bf16.mxu0 %v4507_v1  ;;  %v4451_v1 = vcombine.high %v1601_v5, %v1605_v59  ;;  %v1558_v57 = vld [vmem:[#allocation6 + $0x1f8] sm:$0xff] }
 0x2d6   :  { %v1682_v58 = vld [vmem:[#allocation6 + $0x5d8] sm:$0xff] }
 0x2d7   :  { %3244 = vmatpush1.bf16.msra.mxu1 %v4378_v10  ;;  %v1725_v10 = vld [vmem:[#allocation6 + $0x730] sm:$0xff] }
 0x2d8   :  { %3285 = vmatpush1.bf16.msra.mxu0 %v4506_v11  ;;  %3245 = vmatprep.subr.bf16.mxu1 %v4371_v12  ;;  %v4450_v11 = vcombine.low %v1601_v5, %v1605_v59  ;;  %v4578_v12 = vcombine.low %v1729_v60, %v1733_v61  ;;  %v4571_v14 = vcombine.high %v1721_v9, %v1725_v10  ;;  %v1546_v59 = vld [vmem:[#allocation6 + $0x198] sm:$0xff] }
 0x2d9   :  { %3286 = vmatprep.subr.bf16.mxu0 %v4499_v13  ;;  %v4443_v13 = vcombine.high %v1593_v7, %v1597_v8  ;;  %v1550_v60 = vld [vmem:[#allocation6 + $0x1b8] sm:$0xff]  ;;  %v4404_v61 = vcombine.low %v1554_v56, %v1558_v57 }
 0x2db   :  { %3246 = vmatpush1.bf16.msra.mxu1 %v4370_v21  ;;  %v1717_v21 = vld [vmem:[#allocation6 + $0x6f0] sm:$0xff] }
 0x2dc   :  { %3287 = vmatpush1.bf16.msra.mxu0 %v4498_v22  ;;  %3247 = vmatprep.subr.bf16.mxu1 %v4363_v23  ;;  %v4442_v22 = vcombine.low %v1593_v7, %v1597_v8  ;;  %v4570_v23 = vcombine.low %v1721_v9, %v1725_v10  ;;  %v4563_v25 = vcombine.high %v1713_v20, %v1717_v21  ;;  %v1538_v7 = vld [vmem:[#allocation6 + $0x158] sm:$0xff] }
 0x2dd   :  { %3288 = vmatprep.subr.bf16.mxu0 %v4491_v24  ;;  %v4435_v24 = vcombine.high %v1585_v15, %v1589_v18  ;;  %v1542_v8 = vld [vmem:[#allocation6 + $0x178] sm:$0xff] }
 0x2de   :  { %v1666_v10 = vld [vmem:[#allocation6 + $0x558] sm:$0xff] }
 0x2df   :  { %3248 = vmatpush1.bf16.msra.mxu1 %v4362_v33  ;;  %v1709_v33 = vld [vmem:[#allocation6 + $0x6b0] sm:$0xff] }
 0x2e0   :  { %3289 = vmatpush1.bf16.msra.mxu0 %v4490_v34  ;;  %3249 = vmatprep.subr.bf16.mxu1 %v4355_v35  ;;  %v4434_v34 = vcombine.low %v1585_v15, %v1589_v18  ;;  %v4562_v35 = vcombine.low %v1713_v20, %v1717_v21  ;;  %v4555_v37 = vcombine.high %v1705_v32, %v1709_v33  ;;  %v1530_v18 = vld [vmem:[#allocation6 + $0x118] sm:$0xff] }
 0x2e1   :  { %3290 = vmatprep.subr.bf16.mxu0 %v4483_v36  ;;  %v4427_v36 = vcombine.high %v1577_v27, %v1581_v28  ;;  %v1534_v20 = vld [vmem:[#allocation6 + $0x138] sm:$0xff] }
 0x2e2   :  { %v1658_v21 = vld [vmem:[#allocation6 + $0x518] sm:$0xff] }
 0x2e3   :  { %3250 = vmatpush1.bf16.msra.mxu1 %v4354_v41  ;;  %v1701_v41 = vld [vmem:[#allocation6 + $0x670] sm:$0xff] }
 0x2e4   :  { %3291 = vmatpush1.bf16.msra.mxu0 %v4482_v45  ;;  %3251 = vmatprep.subr.bf16.mxu1 %v4347_v49  ;;  %v4426_v45 = vcombine.low %v1577_v27, %v1581_v28  ;;  %v4554_v49 = vcombine.low %v1705_v32, %v1709_v33  ;;  %v4547_v53 = vcombine.high %v1697_v40, %v1701_v41  ;;  %v1522_v27 = vld [vmem:[#allocation6 + $0xd8] sm:$0xff] }
 0x2e5   :  { %3292 = vmatprep.subr.bf16.mxu0 %v4475_v51  ;;  %v4419_v51 = vcombine.high %v1569_v38, %v1573_v39  ;;  %v1526_v28 = vld [vmem:[#allocation6 + $0xf8] sm:$0xff] }
 0x2e6   :  { %v1650_v32 = vld [vmem:[#allocation6 + $0x4d8] sm:$0xff] }
 0x2e7   :  { %3252 = vmatpush1.bf16.msra.mxu1 %v4346_v46  ;;  %v1693_v46 = vld [vmem:[#allocation6 + $0x630] sm:$0xff]  ;;  %v1654_v33 = vld [vmem:[#allocation6 + $0x4f8] sm:$0xff] }
 0x2e8   :  { %3293 = vmatpush1.bf16.msra.mxu0 %v4474_v47  ;;  %3253 = vmatprep.subr.bf16.mxu1 %v4467_v48  ;;  %v4418_v47 = vcombine.low %v1569_v38, %v1573_v39  ;;  %v4546_v48 = vcombine.low %v1697_v40, %v1701_v41  ;;  %v4539_v55 = vcombine.high %v1689_v44, %v1693_v46  ;;  %v1518_v38 = vld [vmem:[#allocation6 + $0xb8] sm:$0xff] }
 0x2e9   :  { %3294 = vmatprep.subr.bf16.mxu0 %v4595_v54  ;;  %v4411_v54 = vcombine.high %v1561_v42, %v1565_v43  ;;  %v1642_v39 = vld [vmem:[#allocation6 + $0x498] sm:$0xff]  ;;  %v4372_v41 = vcombine.low %v1522_v27, %v1526_v28 }
 0x2ea   :  { %v1646_v40 = vld [vmem:[#allocation6 + $0x4b8] sm:$0xff] }
 0x2eb   :  { %3254 = vmatpush2.bf16.msra.mxu1 %v4466_v63  ;;  %v1686_v63 = vld [vmem:[#allocation6 + $0x5f8] sm:$0xff] }
 0x2ec   :  { %3295 = vmatpush2.bf16.msra.mxu0 %v4594_v2  ;;  %3255 = vmatprep.subr.bf16.mxu1 %v4459_v3  ;;  %v4410_v2 = vcombine.low %v1561_v42, %v1565_v43  ;;  %v4538_v3 = vcombine.low %v1689_v44, %v1693_v46  ;;  %v4533_v5 = vcombine.high %v1682_v58, %v1686_v63  ;;  %v1510_v42 = vld [vmem:[#allocation6 + $0x78] sm:$0xff] }
 0x2ed   :  { %3296 = vmatprep.subr.bf16.mxu0 %v4587_v4  ;;  %v4405_v4 = vcombine.high %v1554_v56, %v1558_v57  ;;  %v1634_v43 = vld [vmem:[#allocation6 + $0x458] sm:$0xff] }
 0x2ee   :  { %v1638_v44 = vld [vmem:[#allocation6 + $0x478] sm:$0xff] }
 0x2ef   :  { %3256 = vmatpush2.bf16.msra.mxu1 %v4458_v62  ;;  %v1674_v62 = vld [vmem:[#allocation6 + $0x598] sm:$0xff] }
 0x2f0   :  { %3297 = vmatpush2.bf16.msra.mxu0 %v4586_v0  ;;  %3257 = vmatprep.subr.bf16.mxu1 %v4451_v1  ;;  %v1678_v0 = vld [vmem:[#allocation6 + $0x5b8] sm:$0xff]  ;;  %v4532_v1 = vcombine.low %v1682_v58, %v1686_v63 }
 0x2f1   :  { %3298 = vmatprep.subr.bf16.mxu0 %v4579_v6  ;;  %v4397_v6 = vcombine.high %v1546_v59, %v1550_v60  ;;  %v4525_v9 = vcombine.high %v1674_v62, %v1678_v0  ;;  %v1502_v56 = vld [vmem:[#allocation6 + $0x38] sm:$0xff] }
 0x2f2   :  { %v1626_v57 = vld [vmem:[#allocation6 + $0x418] sm:$0xff] }
 0x2f3   :  { %3258 = vmatpush2.bf16.msra.mxu1 %v4450_v11  ;;  %v1670_v11 = vld [vmem:[#allocation6 + $0x578] sm:$0xff] }
 0x2f4   :  { %3299 = vmatpush2.bf16.msra.mxu0 %v4578_v12  ;;  %3259 = vmatprep.subr.bf16.mxu1 %v4443_v13  ;;  %v4396_v12 = vcombine.low %v1546_v59, %v1550_v60  ;;  %v4524_v13 = vcombine.low %v1674_v62, %v1678_v0  ;;  %v4517_v15 = vcombine.high %v1666_v10, %v1670_v11  ;;  %v1630_v58 = vld [vmem:[#allocation6 + $0x438] sm:$0xff] }
 0x2f5   :  { %3300 = vmatprep.subr.bf16.mxu0 %v4571_v14  ;;  %v4389_v14 = vcombine.high %v1538_v7, %v1542_v8  ;;  %v1622_v59 = vld [vmem:[#allocation6 + $0x3f8] sm:$0xff]  ;;  %v4476_v0 = vcombine.low %v1626_v57, %v1630_v58 }
 0x2f6   :  { %v1746_v60 = vld [vmem:[#allocation6 + $0x7d8] sm:$0xff] }
 0x2f7   :  { %3260 = vmatpush2.bf16.msra.mxu1 %v4442_v22  ;;  %v1662_v22 = vld [vmem:[#allocation6 + $0x538] sm:$0xff] }
 0x2f8   :  { %3301 = vmatpush2.bf16.msra.mxu0 %v4570_v23  ;;  %3261 = vmatprep.subr.bf16.mxu1 %v4435_v24  ;;  %v4388_v23 = vcombine.low %v1538_v7, %v1542_v8  ;;  %v4516_v24 = vcombine.low %v1666_v10, %v1670_v11  ;;  %v1610_v7 = vld [vmem:[#allocation6 + $0x398] sm:$0xff] }
 0x2f9   :  { %3302 = vmatprep.subr.bf16.mxu0 %v4563_v25  ;;  %v4381_v25 = vcombine.high %v1530_v18, %v1534_v20  ;;  %v1614_v8 = vld [vmem:[#allocation6 + $0x3b8] sm:$0xff] }
 0x2fa   :  { %v1742_v10 = vld [vmem:[#allocation6 + $0x7b8] sm:$0xff] }
 0x2fb   :  { %3262 = vmatpush2.bf16.msra.mxu1 %v4434_v34  ;;  %v4508_v34 = vcombine.low %v1658_v21, %v1662_v22 }
 0x2fc   :  { %3303 = vmatpush2.bf16.msra.mxu0 %v4562_v35  ;;  %3263 = vmatprep.subr.bf16.mxu1 %v4427_v36  ;;  %v4373_v35 = vcombine.high %v1522_v27, %v1526_v28  ;;  %v4501_v36 = vcombine.high %v1650_v32, %v1654_v33  ;;  %v1598_v27 = vld [vmem:[#allocation6 + $0x338] sm:$0xff] }
 0x2fd   :  { %3304 = vmatprep.subr.bf16.mxu0 %v4555_v37  ;;  %v1514_v37 = vld [vmem:[#allocation6 + $0x98] sm:$0xff] }
 0x2fe   :  { %v4364_v46 = vcombine.low %v1514_v37, %v1518_v38  ;;  %v1722_v28 = vld [vmem:[#allocation6 + $0x718] sm:$0xff] }
 0x2ff   :  { %3264 = vmatpush2.bf16.msra.mxu1 %v4426_v45  ;;  %v4500_v45 = vcombine.low %v1650_v32, %v1654_v33  ;;  %v1726_v32 = vld [vmem:[#allocation6 + $0x738] sm:$0xff] }
 0x300   :  { %3305 = vmatpush2.bf16.msra.mxu0 %v4554_v49  ;;  %3265 = vmatprep.subr.bf16.mxu1 %v4419_v51  ;;  %v4365_v49 = vcombine.high %v1514_v37, %v1518_v38  ;;  %v4493_v51 = vcombine.high %v1642_v39, %v1646_v40  ;;  %v1590_v37 = vld [vmem:[#allocation6 + $0x2f8] sm:$0xff] }
 0x301   :  { %3306 = vmatprep.subr.bf16.mxu0 %v4547_v53  ;;  %v1506_v53 = vld [vmem:[#allocation6 + $0x58] sm:$0xff] }
 0x302   :  { %v4356_v63 = vcombine.low %v1506_v53, %v1510_v42  ;;  %v1714_v38 = vld [vmem:[#allocation6 + $0x6d8] sm:$0xff] }
 0x303   :  { %3266 = vmatpush2.bf16.msra.mxu1 %v4418_v47  ;;  %v4492_v47 = vcombine.low %v1642_v39, %v1646_v40  ;;  %v1718_v39 = vld [vmem:[#allocation6 + $0x6f8] sm:$0xff] }
 0x304   :  { %3307 = vmatpush2.bf16.msra.mxu0 %v4546_v48  ;;  %3267 = vmatprep.subr.bf16.mxu1 %v4411_v54  ;;  %v4357_v48 = vcombine.high %v1506_v53, %v1510_v42  ;;  %v4485_v54 = vcombine.high %v1634_v43, %v1638_v44  ;;  %v1582_v53 = vld [vmem:[#allocation6 + $0x2b8] sm:$0xff] }
 0x305   :  { %3308 = vmatprep.subr.bf16.mxu0 %v4539_v55  ;;  %v1498_v55 = vld [vmem:[#allocation6 + $0x18] sm:$0xff] }
 0x306   :  { %v4348_v62 = vcombine.low %v1498_v55, %v1502_v56  ;;  %v1706_v42 = vld [vmem:[#allocation6 + $0x698] sm:$0xff] }
 0x307   :  { %3268 = vmatpush2.bf16.msra.mxu1 %v4410_v2  ;;  %v4484_v2 = vcombine.low %v1634_v43, %v1638_v44  ;;  %v1710_v43 = vld [vmem:[#allocation6 + $0x6b8] sm:$0xff] }
 0x308   :  { %3309 = vmatpush2.bf16.msra.mxu0 %v4538_v3  ;;  %3319 = vmatprep.subr.bf16.mxu1 %v4405_v4  ;;  %v4349_v3 = vcombine.high %v1498_v55, %v1502_v56  ;;  %v4477_v4 = vcombine.high %v1626_v57, %v1630_v58  ;;  %v1574_v55 = vld [vmem:[#allocation6 + $0x278] sm:$0xff] }
 0x309   :  { %3360 = vmatprep.subr.bf16.mxu0 %v4533_v5  ;;  %v1618_v5 = vld [vmem:[#allocation6 + $0x3d8] sm:$0xff] }
 0x30a   :  { %3270 = vmatmul.mubr.bf16.vlgmr.msra.gmra.mxu1 %v5412_v30  ;;  %v4468_v11 = vcombine.low %v1618_v5, %v1622_v59  ;;  %v1698_v56 = vld [vmem:[#allocation6 + $0x658] sm:$0xff] }
 0x30b   :  { %3311 = vmatmul.mubr.bf16.vlgmr.msra.gmra.mxu0 %v5415_v31  ;;  %3320 = vmatpush1.bf16.msra.mxu1 %v4404_v61  ;;  %v1750_v61 = vld [vmem:[#allocation6 + $0x7f8] sm:$0xff] }
 0x30c   :  { %3351 = vmatprep.mubr.bf16.mxu1 %v5408_v26  ;;  %3361 = vmatpush1.bf16.msra.mxu0 %v4532_v1  ;;  %v4509_v26 = vcombine.high %v1658_v21, %v1662_v22  ;;  %v4469_v1 = vcombine.high %v1618_v5, %v1622_v59  ;;  %v1734_v21 = vld [vmem:[#allocation6 + $0x778] sm:$0xff]  ;;  %v4460_v22 = vcombine.low %v1610_v7, %v1614_v8 }
 0x30d   :  { %3392 = vmatprep.mubr.bf16.mxu0 %v5410_v29  ;;  %3321 = vmatprep.subr.bf16.mxu1 %v4397_v6  ;;  %v4380_v29 = vcombine.low %v1530_v18, %v1534_v20  ;;  %v4597_v6 = vcombine.high %v1746_v60, %v1750_v61  ;;  %v1606_v18 = vld [vmem:[#allocation6 + $0x378] sm:$0xff] }
 0x30e   :  { %3362 = vmatprep.subr.bf16.mxu0 %v4525_v9  ;;  %v1738_v9 = vld [vmem:[#allocation6 + $0x798] sm:$0xff] }
 0x30f   :  { %3322 = vmatpush1.bf16.msra.mxu1 %v4396_v12  ;;  %v4596_v12 = vcombine.low %v1746_v60, %v1750_v61  ;;  %v1730_v20 = vld [vmem:[#allocation6 + $0x758] sm:$0xff] }
 0x310   :  { %3363 = vmatpush1.bf16.msra.mxu0 %v4524_v13  ;;  %3323 = vmatprep.subr.bf16.mxu1 %v4389_v14  ;;  %v4461_v13 = vcombine.high %v1610_v7, %v1614_v8  ;;  %v4589_v14 = vcombine.high %v1738_v9, %v1742_v10  ;;  %v1702_v57 = vld [vmem:[#allocation6 + $0x678] sm:$0xff]  ;;  %v5439_v8 = vld [vmem:[%s5473_s6] sm:$0xff] }
 0x311   :  { %3364 = vmatprep.subr.bf16.mxu0 %v4517_v15  ;;  %v1602_v15 = vld [vmem:[#allocation6 + $0x358] sm:$0xff] }
 0x312   :  { %v4452_v33 = vcombine.low %v1602_v15, %v1606_v18  ;;  %v1566_v5 = vld [vmem:[#allocation6 + $0x238] sm:$0xff] }
 0x313   :  { %3324 = vmatpush1.bf16.msra.mxu1 %v4388_v23  ;;  %v4588_v23 = vcombine.low %v1738_v9, %v1742_v10  ;;  %v1690_v59 = vld [vmem:[#allocation6 + $0x618] sm:$0xff] }
 0x314   :  { %3365 = vmatpush1.bf16.msra.mxu0 %v4516_v24  ;;  %3325 = vmatprep.subr.bf16.mxu1 %v4381_v25  ;;  %v4453_v24 = vcombine.high %v1602_v15, %v1606_v18  ;;  %v4581_v25 = vcombine.high %v1730_v20, %v1734_v21  ;;  %v1694_v60 = vld [vmem:[#allocation6 + $0x638] sm:$0xff]  ;;  %v1760_v15 = vrot.slane %v5439_v8, %v5371_v19  ;;  %v5061_v18 = vld [vmem:[#allocation7 + $0xf0] sm:$0xff]   ;;  %v5063_v19 = vld [vmem:[#allocation7 + $0xe8] sm:$0xff]  }
 0x315   :  { %3366 = vmatprep.subr.bf16.mxu0 %v4509_v26  ;;  %v1594_v26 = vld [vmem:[#allocation6 + $0x318] sm:$0xff]  ;;  %v4540_v7 = vcombine.low %v1690_v59, %v1694_v60 }
 0x316   :  { %v4444_v40 = vcombine.low %v1594_v26, %v1598_v27  ;;  %v5043_v9 = vld [vmem:[#allocation7 + $0x78] sm:$0xff]  }
 0x317   :  { %3326 = vmatpush1.bf16.msra.mxu1 %v4380_v29  ;;  %v4580_v29 = vcombine.low %v1730_v20, %v1734_v21  ;;  %v5059_v10 = vld [vmem:[#allocation7 + $0xf8] sm:$0xff]  }
 0x318   :  { %3367 = vmatpush1.bf16.msra.mxu0 %v4508_v34  ;;  %3327 = vmatprep.subr.bf16.mxu1 %v4373_v35  ;;  %v4445_v34 = vcombine.high %v1594_v26, %v1598_v27  ;;  %v4573_v35 = vcombine.high %v1722_v28, %v1726_v32 }
 0x319   :  { %3368 = vmatprep.subr.bf16.mxu0 %v4501_v36  ;;  %v1586_v36 = vld [vmem:[#allocation6 + $0x2d8] sm:$0xff] }
 0x31a   :  { %v4436_v44 = vcombine.low %v1586_v36, %v1590_v37 }
 0x31b   :  { %3328 = vmatpush1.bf16.msra.mxu1 %v4372_v41  ;;  %v4572_v41 = vcombine.low %v1722_v28, %v1726_v32 }
 0x31c   :  { %3369 = vmatpush1.bf16.msra.mxu0 %v4500_v45  ;;  %3329 = vmatprep.subr.bf16.mxu1 %v4365_v49  ;;  %v4437_v45 = vcombine.high %v1586_v36, %v1590_v37  ;;  %v4565_v49 = vcombine.high %v1714_v38, %v1718_v39  ;;  %v5064_v36 = vld [vmem:[#allocation7 + $0xa8] sm:$0xff]  }
 0x31d   :  { %3370 = vmatprep.subr.bf16.mxu0 %v4493_v51  ;;  %v1578_v51 = vld [vmem:[#allocation6 + $0x298] sm:$0xff] }
 0x31e   :  { %v4428_v58 = vcombine.low %v1578_v51, %v1582_v53 }
 0x31f   :  { %3330 = vmatpush1.bf16.msra.mxu1 %v4364_v46  ;;  %v4564_v46 = vcombine.low %v1714_v38, %v1718_v39  ;;  %v5065_v39 = vld [vmem:[#allocation7 + $0xe0] sm:$0xff]  }
 0x320   :  { %3371 = vmatpush1.bf16.msra.mxu0 %v4492_v47  ;;  %3331 = vmatprep.subr.bf16.mxu1 %v4357_v48  ;;  %v4429_v47 = vcombine.high %v1578_v51, %v1582_v53  ;;  %v4557_v48 = vcombine.high %v1706_v42, %v1710_v43  ;;  %v5052_v51 = vld [vmem:[#allocation7 + $0x18] sm:$0xff]   ;;  %v5053_v53 = vld [vmem:[#allocation7 + $0x50] sm:$0xff]  }
 0x321   :  { %3372 = vmatprep.subr.bf16.mxu0 %v4485_v54  ;;  %v1570_v54 = vld [vmem:[#allocation6 + $0x258] sm:$0xff] }
 0x322   :  { %v4420_v61 = vcombine.low %v1570_v54, %v1574_v55 }
 0x323   :  { %3332 = vmatpush1.bf16.msra.mxu1 %v4356_v63  ;;  %v4556_v63 = vcombine.low %v1706_v42, %v1710_v43  ;;  %v5068_v42 = vld [vmem:[#allocation7 + $0x98] sm:$0xff]   ;;  %v5069_v43 = vld [vmem:[#allocation7 + $0xd0] sm:$0xff]  }
 0x324   :  { %3373 = vmatpush1.bf16.msra.mxu0 %v4484_v2  ;;  %3333 = vmatprep.subr.bf16.mxu1 %v4349_v3  ;;  %v4421_v2 = vcombine.high %v1570_v54, %v1574_v55  ;;  %v4549_v3 = vcombine.high %v1698_v56, %v1702_v57 }
 0x325   :  { %3374 = vmatprep.subr.bf16.mxu0 %v4477_v4  ;;  %v1562_v4 = vld [vmem:[#allocation6 + $0x218] sm:$0xff] }
 0x327   :  { %3334 = vmatpush1.bf16.msra.mxu1 %v4348_v62  ;;  %v4548_v62 = vcombine.low %v1698_v56, %v1702_v57  ;;  %v5056_v56 = vld [vmem:[#allocation7 + $0x8] sm:$0xff]  }
 0x328   :  { %3375 = vmatpush1.bf16.msra.mxu0 %v4476_v0  ;;  %3335 = vmatprep.subr.bf16.mxu1 %v4469_v1  ;;  %v4413_v0 = vcombine.high %v1562_v4, %v1566_v5  ;;  %v4541_v1 = vcombine.high %v1690_v59, %v1694_v60  ;;  %v5075_v59 = vld [vmem:[#allocation7 + $0x178] sm:$0xff]  }
 0x329   :  { %3376 = vmatprep.subr.bf16.mxu0 %v4597_v6  ;;  %v4412_v6 = vcombine.low %v1562_v4, %v1566_v5  ;;  %v5058_v4 = vld [vmem:[#allocation7] sm:$0xff]  }
 0x32a   :  { %v5074_v5 = vld [vmem:[#allocation7 + $0x80] sm:$0xff]  }
 0x32b   :  { %3336 = vmatpush2.bf16.msra.mxu1 %v4468_v11  ;;  %v1756_v11 = vrot.slane %v5439_v8, %v5365_v17 }
 0x32c   :  { %3377 = vmatpush2.bf16.msra.mxu0 %v4596_v12  ;;  %3337 = vmatprep.subr.bf16.mxu1 %v4461_v13  ;;  %v5044_v12 = vld [vmem:[#allocation7 + $0x38] sm:$0xff]   ;;  %v5045_v13 = vld [vmem:[#allocation7 + $0x70] sm:$0xff]  }
 0x32d   :  { %3378 = vmatprep.subr.bf16.mxu0 %v4589_v14  ;;  %v5060_v14 = vld [vmem:[#allocation7 + $0xb8] sm:$0xff]  }
 0x32f   :  { %3338 = vmatpush2.bf16.msra.mxu1 %v4460_v22 }
 0x330   :  { %3379 = vmatpush2.bf16.msra.mxu0 %v4588_v23  ;;  %3339 = vmatprep.subr.bf16.mxu1 %v4453_v24  ;;  %v5046_v23 = vld [vmem:[#allocation7 + $0x30] sm:$0xff]   ;;  %v5047_v24 = vld [vmem:[#allocation7 + $0x68] sm:$0xff]  }
 0x331   :  { %3380 = vmatprep.subr.bf16.mxu0 %v4581_v25  ;;  %v5062_v25 = vld [vmem:[#allocation7 + $0xb0] sm:$0xff]  }
 0x333   :  { %3340 = vmatpush2.bf16.msra.mxu1 %v4452_v33 }
 0x334   :  { %3381 = vmatpush2.bf16.msra.mxu0 %v4580_v29  ;;  %3341 = vmatprep.subr.bf16.mxu1 %v4445_v34 }
 0x335   :  { %3382 = vmatprep.subr.bf16.mxu0 %v4573_v35  ;;  %v5049_v35 = vld [vmem:[#allocation7 + $0x60] sm:$0xff]  }
 0x337   :  { %3342 = vmatpush2.bf16.msra.mxu1 %v4444_v40  ;;  %v5050_v40 = vld [vmem:[#allocation7 + $0x20] sm:$0xff]  }
 0x338   :  { %3383 = vmatpush2.bf16.msra.mxu0 %v4572_v41  ;;  %3343 = vmatprep.subr.bf16.mxu1 %v4437_v45  ;;  %v5051_v41 = vld [vmem:[#allocation7 + $0x58] sm:$0xff]   ;;  %v5066_v45 = vld [vmem:[#allocation7 + $0xa0] sm:$0xff]  }
 0x339   :  { %3384 = vmatprep.subr.bf16.mxu0 %v4565_v49  ;;  %v5067_v49 = vld [vmem:[#allocation7 + $0xd8] sm:$0xff]  }
 0x33b   :  { %3344 = vmatpush2.bf16.msra.mxu1 %v4436_v44  ;;  %v5054_v44 = vld [vmem:[#allocation7 + $0x10] sm:$0xff]  }
 0x33c   :  { %3385 = vmatpush2.bf16.msra.mxu0 %v4564_v46  ;;  %3345 = vmatprep.subr.bf16.mxu1 %v4429_v47  ;;  %v5055_v46 = vld [vmem:[#allocation7 + $0x48] sm:$0xff]   ;;  %v5070_v47 = vld [vmem:[#allocation7 + $0x90] sm:$0xff]  }
 0x33d   :  { %3386 = vmatprep.subr.bf16.mxu0 %v4557_v48  ;;  %v5071_v48 = vld [vmem:[#allocation7 + $0xc8] sm:$0xff]  }
 0x33f   :  { %3346 = vmatpush2.bf16.msra.mxu1 %v4428_v58  ;;  %v5057_v58 = vld [vmem:[#allocation7 + $0x40] sm:$0xff]  }
 0x340   :  { %3387 = vmatpush2.bf16.msra.mxu0 %v4556_v63  ;;  %3347 = vmatprep.subr.bf16.mxu1 %v4421_v2  ;;  %v5072_v63 = vld [vmem:[#allocation7 + $0x88] sm:$0xff]  }
 0x341   :  { %3388 = vmatprep.subr.bf16.mxu0 %v4549_v3  ;;  %v5073_v3 = vld [vmem:[#allocation7 + $0xc0] sm:$0xff]  }
 0x343   :  { %3348 = vmatpush2.bf16.msra.mxu1 %v4420_v61 }
 0x344   :  { %3389 = vmatpush2.bf16.msra.mxu0 %v4548_v62  ;;  %3349 = vmatprep.subr.bf16.mxu1 %v4413_v0  ;;  %v5076_v0 = vld [vmem:[#allocation7 + $0x138] sm:$0xff]  }
 0x345   :  { %3390 = vmatprep.subr.bf16.mxu0 %v4541_v1 }
 0x347   :  { %3350 = vmatpush2.bf16.msra.mxu1 %v4412_v6  ;;  %v5077_v6 = vld [vmem:[#allocation7 + $0x170] sm:$0xff]  }
 0x348   :  { %3391 = vmatpush2.bf16.msra.mxu0 %v4540_v7  ;;  %4671 = vmatprep.subr.bf16.mxu1 %v5043_v9  ;;  %v5078_v7 = vld [vmem:[#allocation7 + $0x130] sm:$0xff]   ;;  %v5079_v9 = vld [vmem:[#allocation7 + $0x168] sm:$0xff]  }
 0x349   :  { %4693 = vmatprep.subr.bf16.mxu0 %v5059_v10  ;;  %v5080_v10 = vld [vmem:[#allocation7 + $0x128] sm:$0xff]  }
 0x34a   :  { %3352 = vmatmul.mubr.bf16.vlgmr.msra.gmra.mxu1 %v5412_v30  ;;  %v3107_v20 = vpop.f32.mrf.mxu1 }
 0x34b   :  { %3393 = vmatmul.mubr.bf16.vlgmr.msra.gmra.mxu0 %v5415_v31  ;;  %v3108_v21 = vadd.f32 %v3107_v20, %v1756_v11  ;;  %v3148_v22 = vpop.f32.mrf.mxu0  ;;  %4672 = vmatpush3.bf16.msra.mxu1 %v5044_v12  ;;  %v5048_v31 = vld [vmem:[#allocation7 + $0x28] sm:$0xff]   ;;  %v5081_v11 = vld [vmem:[#allocation7 + $0x160] sm:$0xff]  }
 0x34c   :  { %v3109_v17 = vpop.f32.mrf.mxu1  ;;  %4673 = vmatprep.subr.bf16.mxu1 %v5045_v13  ;;  %4694 = vmatpush3.bf16.msra.mxu0 %v5060_v14  ;;  %v5082_v12 = vld [vmem:[#allocation7 + $0x120] sm:$0xff]   ;;  %v5083_v13 = vld [vmem:[#allocation7 + $0x158] sm:$0xff]   ;;  %v5087_v20 = vld [vmem:[#allocation7 + $0x148] sm:$0xff]  }
 0x34d   :  { %v3149_v26 = vadd.f32 %v3148_v22, %v3108_v21  ;;  %v3110_v27 = vadd.f32 %v3109_v17, %v1760_v15  ;;  %v3150_v28 = vpop.f32.mrf.mxu0  ;;  %4695 = vmatprep.subr.bf16.mxu0 %v5061_v18  ;;  %v5084_v14 = vld [vmem:[#allocation7 + $0x118] sm:$0xff]   ;;  %v5085_v15 = vld [vmem:[#allocation7 + $0x150] sm:$0xff]   ;;  %v1764_v21 = vrot.slane %v5439_v8, %v1055_v50  ;;  %v1768_v22 = vrot.slane %v5439_v8, %v1059_v52 }
 0x34e   :  { %v3111_v32 = vpop.f32.mrf.mxu1  ;;  %v5086_v18 = vld [vmem:[#allocation7 + $0x110] sm:$0xff]  }
 0x34f   :  { %v4598_v33 = vmul.f32 -1.442695, %v3149_v26  ;;  %v3151_v30 = vadd.f32 %v3150_v28, %v3110_v27  ;;  %v3152_v29 = vpop.f32.mrf.mxu0  ;;  %4674 = vmatpush3.bf16.msra.mxu1 %v5046_v23  ;;  %v5088_v23 = vld [vmem:[#allocation7 + $0x108] sm:$0xff]  }
 0x350   :  { %v3112_v34 = vpop.f32.mrf.mxu1  ;;  %4675 = vmatprep.subr.bf16.mxu1 %v5047_v24  ;;  %4696 = vmatpush3.bf16.msra.mxu0 %v5062_v25  ;;  %v5089_v24 = vld [vmem:[#allocation7 + $0x140] sm:$0xff]  }
 0x351   :  { %5131 = vpow2.f32 %v4598_v33  ;;  %v4599_v37 = vmul.f32 -1.442695, %v3151_v30  ;;  %v3153_v38 = vpop.f32.mrf.mxu0  ;;  %4697 = vmatprep.subr.bf16.mxu0 %v5063_v19  ;;  %v5090_v33 = vld [vmem:[#allocation7 + $0x100] sm:$0xff]  }
 0x353   :  { %5133 = vpow2.f32 %v4599_v37  ;;  %4676 = vmatpush3.bf16.msra.mxu1 %v5048_v31 }
 0x354   :  { %4677 = vmatprep.subr.bf16.mxu1 %v5049_v35  ;;  %4698 = vmatpush3.bf16.msra.mxu0 %v5064_v36  ;;  %v5091_v36 = vld [vmem:[#allocation7 + $0x1f8] sm:$0xff]  }
 0x355   :  { %4699 = vmatprep.subr.bf16.mxu0 %v5065_v39 }
 0x357   :  { %4678 = vmatpush3.bf16.msra.mxu1 %v5050_v40 }
 0x358   :  { %4679 = vmatprep.subr.bf16.mxu1 %v5051_v41  ;;  %4700 = vmatpush3.bf16.msra.mxu0 %v5066_v45 }
 0x359   :  { %4701 = vmatprep.subr.bf16.mxu0 %v5067_v49 }
 0x35b   :  { %4680 = vmatpush3.bf16.msra.mxu1 %v5052_v51  ;;  %v5092_v51 = vld [vmem:[#allocation7 + $0x1b8] sm:$0xff]  }
 0x35c   :  { %4681 = vmatprep.subr.bf16.mxu1 %v5053_v53  ;;  %4702 = vmatpush3.bf16.msra.mxu0 %v5068_v42  ;;  %v5093_v42 = vld [vmem:[#allocation7 + $0x1f0] sm:$0xff]  }
 0x35d   :  { %4703 = vmatprep.subr.bf16.mxu0 %v5069_v43  ;;  %v5094_v43 = vld [vmem:[#allocation7 + $0x1b0] sm:$0xff]  }
 0x35e   :  { %v5132_v54 = vpop.eup %5131 }
 0x35f   :  { %v3425_v55 = vadd.f32 1.0, %v5132_v54  ;;  %4682 = vmatpush3.bf16.msra.mxu1 %v5054_v44  ;;  %v5095_v44 = vld [vmem:[#allocation7 + $0x1e8] sm:$0xff]   ;;  %v5099_v54 = vld [vmem:[#allocation7 + $0x1d8] sm:$0xff]  }
 0x360   :  { %v5134_v57 = vpop.eup %5133  ;;  %4683 = vmatprep.subr.bf16.mxu1 %v5055_v46  ;;  %4704 = vmatpush3.bf16.msra.mxu0 %v5070_v47  ;;  %v5096_v46 = vld [vmem:[#allocation7 + $0x1a8] sm:$0xff]   ;;  %v5097_v47 = vld [vmem:[#allocation7 + $0x1e0] sm:$0xff]  }
 0x361   :  { %v3426_v2 = vadd.f32 1.0, %v5134_v57  ;;  %4705 = vmatprep.subr.bf16.mxu0 %v5071_v48  ;;  %5135 = vrcp.f32 %v3425_v55  ;;  %v5098_v48 = vld [vmem:[#allocation7 + $0x1a0] sm:$0xff]   ;;  %v5100_v55 = vld [vmem:[#allocation7 + $0x198] sm:$0xff]   ;;  %v1771_v57 = vsub.s32 4, %v5362_v16 }
 0x363   :  { %5137 = vrcp.f32 %v3426_v2  ;;  %4684 = vmatpush3.bf16.msra.mxu1 %v5056_v56  ;;  %v5101_v56 = vld [vmem:[#allocation7 + $0x1d0] sm:$0xff]   ;;  %v5103_v2 = vld [vmem:[#allocation7 + $0x1c8] sm:$0xff]  }
 0x364   :  { %4685 = vmatprep.subr.bf16.mxu1 %v5057_v58  ;;  %4706 = vmatpush3.bf16.msra.mxu0 %v5072_v63  ;;  %v1775_v58 = vsub.s32 5, %v5362_v16  ;;  %v5102_v63 = vld [vmem:[#allocation7 + $0x190] sm:$0xff]  }
 0x365   :  { %4707 = vmatprep.subr.bf16.mxu0 %v5073_v3  ;;  %v1772_v3 = vrot.slane %v5439_v8, %v1771_v57 }
 0x367   :  { %4686 = vmatpush3.bf16.msra.mxu1 %v5058_v4  ;;  %v1776_v4 = vrot.slane %v5439_v8, %v1775_v58 }
 0x368   :  { %4708 = vmatpush3.bf16.msra.mxu0 %v5074_v5  ;;  %4715 = vmatprep.subr.bf16.mxu1 %v5075_v59  ;;  %v5104_v5 = vld [vmem:[#allocation7 + $0x188] sm:$0xff]  }
 0x369   :  { %4737 = vmatprep.subr.bf16.mxu0 %v5091_v36 }
 0x36e   :  { %v5136_v60 = vpop.eup %5135 }
 0x36f   :  { %v3449_v1 = vpack.c.bf16 %v5136_v60, %v5136_v60  ;;  %v5105_v60 = vld [vmem:[#allocation7 + $0x1c0] sm:$0xff]  }
 0x370   :  { %v5138_v61 = vpop.eup %5137 }
 0x371   :  { %v3450_v62 = vpack.c.bf16 %v5138_v61, %v5138_v61 }
 0x373   :  { %4008 = vmatprep.mubr.bf16.mxu1 %v3450_v62 }
 0x374   :  { %4009 = vmatmul.mubr.bf16.vlgmr.msra.gmra.mxu1 %v3449_v1 }
 0x375   :  { %4716 = vmatpush3.bf16.msra.mxu1 %v5076_v0 }
 0x376   :  { %4717 = vmatprep.subr.bf16.mxu1 %v5077_v6 }
 0x379   :  { %4718 = vmatpush3.bf16.msra.mxu1 %v5078_v7 }
 0x37a   :  { %4719 = vmatprep.subr.bf16.mxu1 %v5079_v9  ;;  %v5106_v9 = vld [vmem:[#allocation7 + $0x180] sm:$0xff]  }
 0x37d   :  { %4720 = vmatpush3.bf16.msra.mxu1 %v5080_v10 }
 0x37e   :  { %4721 = vmatprep.subr.bf16.mxu1 %v5081_v11 }
 0x381   :  { %4722 = vmatpush3.bf16.msra.mxu1 %v5082_v12 }
 0x382   :  { %4723 = vmatprep.subr.bf16.mxu1 %v5083_v13 }
 0x385   :  { %4724 = vmatpush3.bf16.msra.mxu1 %v5084_v14 }
 0x386   :  { %4725 = vmatprep.subr.bf16.mxu1 %v5085_v15 }
 0x389   :  { %4726 = vmatpush3.bf16.msra.mxu1 %v5086_v18 }
 0x38a   :  { %v3189_v17 = vpop.f32.mrf.mxu1  ;;  %4727 = vmatprep.subr.bf16.mxu1 %v5087_v20 }
 0x38b   :  { %v3190_v25 = vadd.f32 %v3189_v17, %v1764_v21  ;;  %v3230_v26 = vpop.f32.mrf.mxu0 }
 0x38c   :  { %v3191_v27 = vpop.f32.mrf.mxu1 }
 0x38d   :  { %v3231_v28 = vadd.f32 %v3230_v26, %v3190_v25  ;;  %v3192_v19 = vadd.f32 %v3191_v27, %v1768_v22  ;;  %v3232_v32 = vpop.f32.mrf.mxu0  ;;  %4728 = vmatpush3.bf16.msra.mxu1 %v5088_v23  ;;  %v1779_v27 = vsub.s32 6, %v5362_v16 }
 0x38e   :  { %v3193_v30 = vpop.f32.mrf.mxu1  ;;  %4729 = vmatprep.subr.bf16.mxu1 %v5089_v24 }
 0x38f   :  { %v4600_v50 = vmul.f32 -1.442695, %v3231_v28  ;;  %v3233_v29 = vadd.f32 %v3232_v32, %v3192_v19  ;;  %v3234_v31 = vpop.f32.mrf.mxu0  ;;  %v1783_v28 = vsub.s32 7, %v5362_v16  ;;  %v1780_v19 = vrot.slane %v5439_v8, %v1779_v27 }
 0x390   :  { %v3194_v34 = vpop.f32.mrf.mxu1 }
 0x391   :  { %5139 = vpow2.f32 %v4600_v50  ;;  %v4601_v52 = vmul.f32 -1.442695, %v3233_v29  ;;  %v3235_v35 = vpop.f32.mrf.mxu0  ;;  %4730 = vmatpush3.bf16.msra.mxu1 %v5090_v33  ;;  %v1784_v32 = vrot.slane %v5439_v8, %v1783_v28 }
 0x393   :  { %5141 = vpow2.f32 %v4601_v52 }
 0x39e   :  { %v5140_v37 = vpop.eup %5139 }
 0x39f   :  { %v3427_v38 = vadd.f32 1.0, %v5140_v37 }
 0x3a0   :  { %v5142_v39 = vpop.eup %5141 }
 0x3a1   :  { %v3428_v40 = vadd.f32 1.0, %v5142_v39  ;;  %5143 = vrcp.f32 %v3427_v38 }
 0x3a3   :  { %5145 = vrcp.f32 %v3428_v40 }
 0x3ae   :  { %v5144_v41 = vpop.eup %5143 }
 0x3af   :  { %v3451_v53 = vpack.c.bf16 %v5144_v41, %v5144_v41 }
 0x3b0   :  { %v5146_v45 = vpop.eup %5145 }
 0x3b1   :  { %v3452_v49 = vpack.c.bf16 %v5146_v45, %v5146_v45 }
 0x3b3   :  { %4048 = vmatprep.mubr.bf16.mxu0 %v3452_v49 }
 0x3b4   :  { %4049 = vmatmul.mubr.bf16.vlgmr.msra.gmra.mxu0 %v3451_v53 }
 0x3b5   :  { %4738 = vmatpush3.bf16.msra.mxu0 %v5092_v51 }
 0x3b6   :  { %4739 = vmatprep.subr.bf16.mxu0 %v5093_v42 }
 0x3b9   :  { %4740 = vmatpush3.bf16.msra.mxu0 %v5094_v43 }
 0x3ba   :  { %4741 = vmatprep.subr.bf16.mxu0 %v5095_v44 }
 0x3bd   :  { %4742 = vmatpush3.bf16.msra.mxu0 %v5096_v46 }
 0x3be   :  { %4743 = vmatprep.subr.bf16.mxu0 %v5097_v47 }
 0x3c1   :  { %4744 = vmatpush3.bf16.msra.mxu0 %v5098_v48 }
 0x3c2   :  { %4745 = vmatprep.subr.bf16.mxu0 %v5099_v54 }
 0x3c5   :  { %4746 = vmatpush3.bf16.msra.mxu0 %v5100_v55  ;;  %v4606_v55 = vld [vmem:[%s5475_s8] ss:$0 sm:$0xff] }
 0x3c6   :  { %4747 = vmatprep.subr.bf16.mxu0 %v5101_v56 }
 0x3c9   :  { %4748 = vmatpush3.bf16.msra.mxu0 %v5102_v63 }
 0x3ca   :  { %v3271_v59 = vpop.f32.mrf.mxu1  ;;  %4749 = vmatprep.subr.bf16.mxu0 %v5103_v2 }
 0x3cb   :  { %v3272_v61 = vadd.f32 %v3271_v59, %v1772_v3  ;;  %v3312_v62 = vpop.f32.mrf.mxu0 }
 0x3cc   :  { %v3273_v0 = vpop.f32.mrf.mxu1 }
 0x3cd   :  { %v3313_v1 = vadd.f32 %v3312_v62, %v3272_v61  ;;  %v3274_v6 = vadd.f32 %v3273_v0, %v1776_v4  ;;  %v3314_v7 = vpop.f32.mrf.mxu0  ;;  %4750 = vmatpush3.bf16.msra.mxu0 %v5104_v5 }
 0x3ce   :  { %v3275_v10 = vpop.f32.mrf.mxu1  ;;  %4751 = vmatprep.subr.bf16.mxu0 %v5105_v60 }
 0x3cf   :  { %v4602_v11 = vmul.f32 -1.442695, %v3313_v1  ;;  %v3315_v12 = vadd.f32 %v3314_v7, %v3274_v6  ;;  %v3316_v13 = vpop.f32.mrf.mxu0 }
 0x3d0   :  { %v3276_v14 = vpop.f32.mrf.mxu1 }
 0x3d1   :  { %5147 = vpow2.f32 %v4602_v11  ;;  %v4603_v15 = vmul.f32 -1.442695, %v3315_v12  ;;  %v3317_v18 = vpop.f32.mrf.mxu0  ;;  %4752 = vmatpush3.bf16.msra.mxu0 %v5106_v9 }
 0x3d3   :  { %5149 = vpow2.f32 %v4603_v15 }
 0x3de   :  { %v5148_v20 = vpop.eup %5147 }
 0x3df   :  { %v3429_v21 = vadd.f32 1.0, %v5148_v20 }
 0x3e0   :  { %v5150_v22 = vpop.eup %5149 }
 0x3e1   :  { %v3430_v23 = vadd.f32 1.0, %v5150_v22  ;;  %5151 = vrcp.f32 %v3429_v21 }
 0x3e3   :  { %5153 = vrcp.f32 %v3430_v23 }
 0x3ee   :  { %v5152_v17 = vpop.eup %5151 }
 0x3ef   :  { %v3453_v26 = vpack.c.bf16 %v5152_v17, %v5152_v17 }
 0x3f0   :  { %v5154_v24 = vpop.eup %5153 }
 0x3f1   :  { %v3454_v25 = vpack.c.bf16 %v5154_v24, %v5154_v24 }
 0x3f3   :  { %4088 = vmatprep.mubr.bf16.mxu1 %v3454_v25 }
 0x3f4   :  { %4089 = vmatmul.mubr.bf16.vlgmr.msra.gmra.mxu1 %v3453_v26 }
 0x40a   :  { %v3353_v33 = vpop.f32.mrf.mxu1 }
 0x40b   :  { %v3354_v30 = vadd.f32 %v3353_v33, %v1780_v19  ;;  %v3394_v50 = vpop.f32.mrf.mxu0 }
 0x40c   :  { %v3355_v29 = vpop.f32.mrf.mxu1 }
 0x40d   :  { %v3395_v31 = vadd.f32 %v3394_v50, %v3354_v30  ;;  %v3356_v34 = vadd.f32 %v3355_v29, %v1784_v32  ;;  %v3396_v52 = vpop.f32.mrf.mxu0 }
 0x40e   :  { %v3357_v35 = vpop.f32.mrf.mxu1 }
 0x40f   :  { %v4604_v36 = vmul.f32 -1.442695, %v3395_v31  ;;  %v3397_v37 = vadd.f32 %v3396_v52, %v3356_v34  ;;  %v3398_v38 = vpop.f32.mrf.mxu0 }
 0x410   :  { %v3358_v39 = vpop.f32.mrf.mxu1 }
 0x411   :  { %5155 = vpow2.f32 %v4604_v36  ;;  %v4605_v40 = vmul.f32 -1.442695, %v3397_v37  ;;  %v3399_v41 = vpop.f32.mrf.mxu0 }
 0x413   :  { %5157 = vpow2.f32 %v4605_v40 }
 0x41e   :  { %v5156_v16 = vpop.eup %5155 }
 0x41f   :  { %v3431_v45 = vadd.f32 1.0, %v5156_v16 }
 0x420   :  { %v5158_v49 = vpop.eup %5157 }
 0x421   :  { %v3432_v8 = vadd.f32 1.0, %v5158_v49  ;;  %5159 = vrcp.f32 %v3431_v45 }
 0x423   :  { %5161 = vrcp.f32 %v3432_v8 }
 0x42e   :  { %v5160_v51 = vpop.eup %5159 }
 0x42f   :  { %v3455_v43 = vpack.c.bf16 %v5160_v51, %v5160_v51 }
 0x430   :  { %v5162_v53 = vpop.eup %5161 }
 0x431   :  { %v3456_v42 = vpack.c.bf16 %v5162_v53, %v5162_v53 }
 0x433   :  { %4128 = vmatprep.mubr.bf16.mxu0 %v3456_v42 }
 0x434   :  { %4129 = vmatmul.mubr.bf16.vlgmr.msra.gmra.mxu0 %v3455_v43  ;;  %v4687_v44 = vpop.f32.mrf.mxu1 }
 0x436   :  { %v4688_v46 = vpop.f32.mrf.mxu1 }
 0x437   :  { %v4689_v47 = vadd.f32 %v4688_v46, %v4687_v44 }
 0x438   :  { %v4690_v48 = vpop.f32.mrf.mxu1 }
 0x439   :  { %v4011_v58 = vadd.f32 %v4689_v47, %v4606_v55 }
 0x43a   :  { %v4691_v54 = vpop.f32.mrf.mxu1 }
 0x474   :  { %v4709_v56 = vpop.f32.mrf.mxu0 }
 0x476   :  { %v4710_v57 = vpop.f32.mrf.mxu0 }
 0x477   :  { %v4711_v63 = vadd.f32 %v4710_v57, %v4709_v56 }
 0x478   :  { %v4712_v2 = vpop.f32.mrf.mxu0 }
 0x479   :  { %v4051_v3 = vadd.f32 %v4711_v63, %v4011_v58 }
 0x47a   :  { %v4713_v4 = vpop.f32.mrf.mxu0 }
 0x4b4   :  { %v4731_v5 = vpop.f32.mrf.mxu1 }
 0x4b6   :  { %v4732_v59 = vpop.f32.mrf.mxu1 }
 0x4b7   :  { %v4733_v60 = vadd.f32 %v4732_v59, %v4731_v5 }
 0x4b8   :  { %v4734_v61 = vpop.f32.mrf.mxu1 }
 0x4b9   :  { %v4091_v62 = vadd.f32 %v4733_v60, %v4051_v3 }
 0x4ba   :  { %v4735_v0 = vpop.f32.mrf.mxu1 }
 0x4f4   :  { %v4753_v1 = vpop.f32.mrf.mxu0 }
 0x4f6   :  { %v4754_v6 = vpop.f32.mrf.mxu0 }
 0x4f7   :  { %v4755_v7 = vadd.f32 %v4754_v6, %v4753_v1 }
 0x4f8   :  { %v4756_v9 = vpop.f32.mrf.mxu0 }
 0x4f9   :  { %v4131_v10 = vadd.f32 %v4755_v7, %v4091_v62 }
 0x4fa   :  { %v4757_v11 = vpop.f32.mrf.mxu0 }
 0x4fb   :  { %4136 = vmax.xlane.f32.xlu0 %v4131_v10 }
 0x584   :  { %v4137_v12 = vpop.xlane.xlu0 %4136 }
 0x585   :  { %v4138_v13 = vsub.f32 %v4131_v10, %v4137_v12 }
 0x587   :  { %v4139_v14 = vmul.f32 1.442695, %v4138_v13 }
 0x589   :  { %5163 = vpow2.f32 %v4139_v14 }
 0x596   :  { %v5164_v15 = vpop.eup %5163 }
 0x597   :  { %4141 = vadd.xlane.f32.xlu0 %v5164_v15 }
 0x620   :  { %v4142_v18 = vpop.xlane.xlu0 %4141 }
 0x621   :  { %5165 = vrcp.f32 %v4142_v18 }
 0x62e   :  { %v5166_v20 = vpop.eup %5165 }
 0x62f   :  { %v4144_v21 = vmul.f32 %v5166_v20, %v5164_v15 }
 0x631   :  { %4145 = vst [vmem:[%s5476_s9] sm:$0xff] %v4144_v21 }
 0x632   :  { %4150 = vsyncpa [#allocation3], 1 }
 0x633   :  { %4151 = vsyncpa [#allocation5], 1 }
 0x634   :  { %4152 = vsyncpa [#allocation8], 1 }

</bundles_post_ra>
